<compile_context>
chip_gen: v5e
topology: v5e:2x2
jax: 0.10.0
libtpu: 0.0.40
codegen_flags: <defaults>
</compile_context>

<pallas_src>
import functools
import math

import jax
import jax.numpy as jnp
from jax.experimental import pallas as pl
from jax.experimental.pallas import tpu as pltpu


_MXU_DTYPE = jnp.bfloat16   # MXU operand dtype; accumulation stays f32.


# ----------------------------------------------------------------------------
# In-kernel helpers
# ----------------------------------------------------------------------------
def _mxu(a, b):
    """2-D matmul a @ b on the MXU: bf16 operands, f32 accumulation."""
    return jax.lax.dot_general(
        a.astype(_MXU_DTYPE), b.astype(_MXU_DTYPE),
        (((a.ndim - 1,), (0,)), ((), ())),
        preferred_element_type=jnp.float32)


def _mxu_nt(a, b):
    """a @ b.T on the MXU (contract last dims of both), bf16 operands, f32 acc."""
    return jax.lax.dot_general(
        a.astype(_MXU_DTYPE), b.astype(_MXU_DTYPE),
        (((1,), (1,)), ((), ())),
        preferred_element_type=jnp.float32)


def _cln(x, dg, db, g, b, eps):
    """Conditional LayerNorm on a (T, D) tile.

    torch.std semantics: unbiased variance (ddof=1), eps added OUTSIDE the sqrt.
    dg/db/g/b: (1, D).
    """
    d = x.shape[-1]
    mean = jnp.mean(x, axis=-1, keepdims=True)
    diff = x - mean
    var = jnp.sum(diff * diff, axis=-1, keepdims=True) * (1.0 / (d - 1))
    inv = pl.reciprocal(jnp.sqrt(var) + eps, approx=True)
    return (g + dg) * diff * inv + (b + db)


def _mha(q, k, v, mask, num_heads, scale):
    """Multi-head attention on VMEM-resident tiles. q:(Tq,D) k,v:(Tk,D) mask:(Tq,Tk)."""
    d = q.shape[-1]
    dk = d // num_heads
    outs = []
    for h in range(num_heads):                       # statically unrolled
        lo, hi = h * dk, (h + 1) * dk
        qh = q[:, lo:hi] * scale                     # scale q (fewer elems than scores)
        kh = k[:, lo:hi]
        vh = v[:, lo:hi]
        s = _mxu_nt(qh, kh)                          # (Tq, Tk) f32
        s = jnp.where(mask == 0.0, -1e9, s)          # masked_fill(mask==0, -1e9)
        s = s - jnp.max(s, axis=-1, keepdims=True)
        p = jnp.exp(s)
        p = p * pl.reciprocal(jnp.sum(p, axis=-1, keepdims=True), approx=True)
        outs.append(_mxu(p, vh))                     # (Tq, dk)
    return jnp.concatenate(outs, axis=-1)            # (Tq, D)


# ----------------------------------------------------------------------------
# Pallas kernels
# ----------------------------------------------------------------------------
def _cln_delta_kernel(mem_ref, gw1_ref, gb1_ref, gw2_ref, gb2_ref,
                      bw1_ref, bb1_ref, bw2_ref, bb2_ref,
                      dg_ref, db_ref):
    """delta_gamma / delta_beta from `memory`, both MLPs fused in one kernel."""
    mem = mem_ref[...].astype(jnp.float32)                         # (B, S*RD)
    hg = jnp.maximum(_mxu(mem, gw1_ref[...]) + gb1_ref[...], 0.0)
    dg_ref[...] = (_mxu(hg, gw2_ref[...]) + gb2_ref[...]).astype(dg_ref.dtype)
    hb = jnp.maximum(_mxu(mem, bw1_ref[...]) + bb1_ref[...], 0.0)
    db_ref[...] = (_mxu(hb, bw2_ref[...]) + bb2_ref[...]).astype(db_ref.dtype)


def _self_attn_sublayer_kernel(x_ref, dg_ref, db_ref, g_ref, b_ref,
                               wqkv_ref, bqkv_ref, wo_ref, bo_ref, mask_ref,
                               o_ref, *, num_heads, eps):
    """x + SelfAttn(CLN(x, memory)) for one batch element."""
    x = x_ref[0].astype(jnp.float32)                               # (T, D)
    d = x.shape[-1]
    xn = _cln(x, dg_ref[0], db_ref[0], g_ref[...], b_ref[...], eps)
    qkv = _mxu(xn, wqkv_ref[...]) + bqkv_ref[...]                  # fused QKV: (T, 3D)
    q, k, v = qkv[:, :d], qkv[:, d:2 * d], qkv[:, 2 * d:]
    scale = 1.0 / math.sqrt(d // num_heads)
    attn = _mha(q, k, v, mask_ref[0], num_heads, scale)
    y = _mxu(attn, wo_ref[...]) + bo_ref[...]
    o_ref[...] = (x + y)[None].astype(o_ref.dtype)                 # residual fused


def _src_attn_sublayer_kernel(x_ref, m_ref, dg_ref, db_ref, g_ref, b_ref,
                              wq_ref, bq_ref, wkv_ref, bkv_ref, wo_ref, bo_ref,
                              mask_ref, o_ref, *, num_heads, eps):
    """x + SrcAttn(CLN(x, memory), m, m) for one batch element."""
    x = x_ref[0].astype(jnp.float32)                               # (T, D)
    m = m_ref[0].astype(jnp.float32)                               # (S, D)
    d = x.shape[-1]
    xn = _cln(x, dg_ref[0], db_ref[0], g_ref[...], b_ref[...], eps)
    q = _mxu(xn, wq_ref[...]) + bq_ref[...]                        # (T, D)
    kv = _mxu(m, wkv_ref[...]) + bkv_ref[...]                      # fused KV: (S, 2D)
    k, v = kv[:, :d], kv[:, d:]
    scale = 1.0 / math.sqrt(d // num_heads)
    attn = _mha(q, k, v, mask_ref[0], num_heads, scale)
    y = _mxu(attn, wo_ref[...]) + bo_ref[...]
    o_ref[...] = (x + y)[None].astype(o_ref.dtype)


def _ffn_sublayer_kernel(x_ref, dg_ref, db_ref, g_ref, b_ref,
                         w1_ref, b1_ref, w2_ref, b2_ref, o_ref, *, eps):
    """x + FFN(CLN(x, memory)) for one batch element."""
    x = x_ref[0].astype(jnp.float32)                               # (T, D)
    xn = _cln(x, dg_ref[0], db_ref[0], g_ref[...], b_ref[...], eps)
    h = jnp.maximum(_mxu(xn, w1_ref[...]) + b1_ref[...], 0.0)
    y = _mxu(h, w2_ref[...]) + b2_ref[...]
    o_ref[...] = (x + y)[None].astype(o_ref.dtype)


# ----------------------------------------------------------------------------
# Decoder layer (4 pallas_calls total: 1 CLN-delta + 3 fused sublayers)
# ----------------------------------------------------------------------------
def decoder_layer(x, hidden_states, src_mask, tgt_mask, memory, params,
                  num_heads, eps=1e-6):
    B, T, D = x.shape
    S = hidden_states.shape[1]
    cln = params["cln"]

    # CLN delta MLPs: computed ONCE (memory is constant across sublayers and the
    # three CLN clones share identical parameters at init).
    dg, db = pl.pallas_call(
        _cln_delta_kernel,
        out_shape=(jax.ShapeDtypeStruct((B, D), jnp.float32),
                   jax.ShapeDtypeStruct((B, D), jnp.float32)),
    )(memory.reshape(B, -1),
      cln["g_w1"], cln["g_b1"], cln["g_w2"], cln["g_b2"],
      cln["b_w1"], cln["b_b1"], cln["b_w2"], cln["b_b2"])
    dg = dg.reshape(B, 1, D)
    db = db.reshape(B, 1, D)
    gamma, beta = cln["gamma"], cln["beta"]            # (1, D)

    tgt_m = jnp.broadcast_to(tgt_mask, (B, T, T)).astype(jnp.float32)
    src_m = jnp.broadcast_to(src_mask, (B, T, S)).astype(jnp.float32)

    row_spec = pl.BlockSpec((1, T, D), lambda b: (b, 0, 0))
    dvec_spec = pl.BlockSpec((1, 1, D), lambda b: (b, 0, 0))
    gvec_spec = pl.BlockSpec((1, D), lambda b: (0, 0))

    def wspec(shape):
        return pl.BlockSpec(shape, lambda b, _n=len(shape): (0,) * _n)

    parallel = pltpu.CompilerParams(dimension_semantics=("parallel",))

    # --- sublayer 0: self-attention ---
    sa = params["self_attn"]
    x = pl.pallas_call(
        functools.partial(_self_attn_sublayer_kernel, num_heads=num_heads, eps=eps),
        out_shape=jax.ShapeDtypeStruct((B, T, D), x.dtype),
        grid=(B,),
        in_specs=[row_spec, dvec_spec, dvec_spec, gvec_spec, gvec_spec,
                  wspec((D, 3 * D)), wspec((1, 3 * D)),
                  wspec((D, D)), wspec((1, D)),
                  pl.BlockSpec((1, T, T), lambda b: (b, 0, 0))],
        out_specs=row_spec,
        compiler_params=parallel,
    )(x, dg, db, gamma, beta, sa["wqkv"], sa["bqkv"], sa["wo"], sa["bo"], tgt_m)

    # --- sublayer 1: source attention ---
    ca = params["src_attn"]
    x = pl.pallas_call(
        functools.partial(_src_attn_sublayer_kernel, num_heads=num_heads, eps=eps),
        out_shape=jax.ShapeDtypeStruct((B, T, D), x.dtype),
        grid=(B,),
        in_specs=[row_spec,
                  pl.BlockSpec((1, S, D), lambda b: (b, 0, 0)),
                  dvec_spec, dvec_spec, gvec_spec, gvec_spec,
                  wspec((D, D)), wspec((1, D)),
                  wspec((D, 2 * D)), wspec((1, 2 * D)),
                  wspec((D, D)), wspec((1, D)),
                  pl.BlockSpec((1, T, S), lambda b: (b, 0, 0))],
        out_specs=row_spec,
        compiler_params=parallel,
    )(x, hidden_states, dg, db, gamma, beta,
      ca["wq"], ca["bq"], ca["wkv"], ca["bkv"], ca["wo"], ca["bo"], src_m)

    # --- sublayer 2: feed-forward ---
    ff = params["ff"]
    d_ff = ff["w1"].shape[1]
    x = pl.pallas_call(
        functools.partial(_ffn_sublayer_kernel, eps=eps),
        out_shape=jax.ShapeDtypeStruct((B, T, D), x.dtype),
        grid=(B,),
        in_specs=[row_spec, dvec_spec, dvec_spec, gvec_spec, gvec_spec,
                  wspec((D, d_ff)), wspec((1, d_ff)),
                  wspec((d_ff, D)), wspec((1, D))],
        out_specs=row_spec,
        compiler_params=parallel,
    )(x, dg, db, gamma, beta, ff["w1"], ff["b1"], ff["w2"], ff["b2"])
    return x


# ----------------------------------------------------------------------------
# Deterministic parameter construction
# ----------------------------------------------------------------------------
def xavier_uniform(key, shape):
    fan_in, fan_out = shape
    limit = math.sqrt(6.0 / (fan_in + fan_out))
    return jax.random.uniform(key, shape, jnp.float32, -limit, limit)


def make_params(key, d_model, d_ff, rm_num_slots, rm_d_model):
    keys = jax.random.split(key, 16)
    kit = iter(keys)

    def lin(k, din, dout, bias_val=0.0):
        return xavier_uniform(k, (din, dout)), jnp.full((1, dout), bias_val, jnp.float32)

    # ConditionalLayerNorm (shared across the 3 sublayers, matching clones() at init).
    g_w1, g_b1 = lin(next(kit), rm_num_slots * rm_d_model, d_model, 0.1)
    g_w2, g_b2 = lin(next(kit), rm_d_model, rm_d_model, 0.1)
    b_w1, b_b1 = lin(next(kit), rm_num_slots * rm_d_model, d_model, 0.1)
    b_w2, b_b2 = lin(next(kit), d_model, d_model, 0.1)
    cln = dict(gamma=jnp.ones((1, d_model), jnp.float32),
               beta=jnp.zeros((1, d_model), jnp.float32),
               g_w1=g_w1, g_b1=g_b1, g_w2=g_w2, g_b2=g_b2,
               b_w1=b_w1, b_b1=b_b1, b_w2=b_w2, b_b2=b_b2)

    def attn_params(fuse_qkv):
        wq, bq = lin(next(kit), d_model, d_model)
        wk, bk = lin(next(kit), d_model, d_model)
        wv, bv = lin(next(kit), d_model, d_model)
        wo, bo = lin(next(kit), d_model, d_model)
        if fuse_qkv:
            return dict(wqkv=jnp.concatenate([wq, wk, wv], axis=1),
                        bqkv=jnp.concatenate([bq, bk, bv], axis=1),
                        wo=wo, bo=bo)
        return dict(wq=wq, bq=bq,
                    wkv=jnp.concatenate([wk, wv], axis=1),
                    bkv=jnp.concatenate([bk, bv], axis=1),
                    wo=wo, bo=bo)

    self_attn = attn_params(True)    # q, k, v all come from CLN(x) -> fuse QKV
    src_attn = attn_params(False)    # q from CLN(x), k/v from hidden_states -> fuse KV

    w1, b1 = lin(next(kit), d_model, d_ff)
    w2, b2 = lin(next(kit), d_ff, d_model)
    ff = dict(w1=w1, b1=b1, w2=w2, b2=b2)

    return dict(cln=cln, self_attn=self_attn, src_attn=src_attn, ff=ff)


# ----------------------------------------------------------------------------
if __name__ == "__main__":
    B, T, S = 2, 8, 8            # batch, target seq, source (hidden_states) seq
    d_model = 32
    rm_d_model = 32              # must equal d_model (module shape constraint)
    rm_num_slots = 3
    num_heads = 4
    d_ff = 64

    key = jax.random.PRNGKey(0)
    k_p, k_x, k_h, k_m = jax.random.split(key, 4)

    params = make_params(k_p, d_model, d_ff, rm_num_slots, rm_d_model)

    x = jax.random.normal(k_x, (B, T, d_model), jnp.float32)
    hidden_states = jax.random.normal(k_h, (B, S, d_model), jnp.float32)
    memory = jax.random.normal(k_m, (B, 1, rm_num_slots * rm_d_model), jnp.float32)
    tgt_mask = jnp.tril(jnp.ones((1, T, T), jnp.float32))   # causal target mask
    src_mask = jnp.ones((B, 1, S), jnp.float32)             # full source mask

    fwd = jax.jit(functools.partial(decoder_layer, num_heads=num_heads))
    out = fwd(x, hidden_states, src_mask, tgt_mask, memory, params)
    jax.block_until_ready(out)
    assert out.shape == (B, T, d_model) and out.dtype == jnp.float32
    assert bool(jnp.all(jnp.isfinite(out)))
    print("KERNEL_OK")
</pallas_src>

<mosaic_0001>
module attributes {stable_mosaic.version = 11 : i64} {
  func.func @_cln_delta_kernel(%arg0: memref<2x96xf32, #tpu.memory_space<vmem>>, %arg1: memref<96x32xf32, #tpu.memory_space<vmem>>, %arg2: memref<1x32xf32, #tpu.memory_space<vmem>>, %arg3: memref<32x32xf32, #tpu.memory_space<vmem>>, %arg4: memref<1x32xf32, #tpu.memory_space<vmem>>, %arg5: memref<96x32xf32, #tpu.memory_space<vmem>>, %arg6: memref<1x32xf32, #tpu.memory_space<vmem>>, %arg7: memref<32x32xf32, #tpu.memory_space<vmem>>, %arg8: memref<1x32xf32, #tpu.memory_space<vmem>>, %arg9: memref<2x32xf32, #tpu.memory_space<vmem>>, %arg10: memref<2x32xf32, #tpu.memory_space<vmem>>) attributes {dimension_semantics = [], scalar_prefetch = 0 : i64, scratch_operands = 0 : i64, tpu.core_type = #tpu.core_type<tc>} {
    %c0 = arith.constant 0 : index
    %c0_0 = arith.constant 0 : index
    %0 = vector.load %arg0[%c0, %c0_0] : memref<2x96xf32, #tpu.memory_space<vmem>>, vector<2x96xf32>
    %c0_1 = arith.constant 0 : index
    %c0_2 = arith.constant 0 : index
    %1 = vector.load %arg1[%c0_1, %c0_2] : memref<96x32xf32, #tpu.memory_space<vmem>>, vector<96x32xf32>
    %2 = arith.truncf %0 : vector<2x96xf32> to vector<2x96xbf16>
    %3 = arith.truncf %1 : vector<96x32xf32> to vector<96x32xbf16>
    %cst = arith.constant dense<0.000000e+00> : vector<2x32xf32>
    %4 = tpu.matmul %2, %3, %cst {dimension_numbers = #tpu.dot_dimension_numbers<[1], [0], [0], [1], [0, 0, 1, 1], [], []>} : vector<2x96xbf16>, vector<96x32xbf16>, vector<2x32xf32> -> vector<2x32xf32>
    %c0_3 = arith.constant 0 : index
    %c0_4 = arith.constant 0 : index
    %5 = vector.load %arg2[%c0_3, %c0_4] : memref<1x32xf32, #tpu.memory_space<vmem>>, vector<1x32xf32>
    %6 = vector.broadcast %5 : vector<1x32xf32> to vector<2x32xf32>
    %7 = arith.addf %4, %6 : vector<2x32xf32>
    %cst_5 = arith.constant 0.000000e+00 : f32
    %8 = vector.broadcast %cst_5 : f32 to vector<2x32xf32>
    %9 = arith.maximumf %7, %8 : vector<2x32xf32>
    %c0_6 = arith.constant 0 : index
    %c0_7 = arith.constant 0 : index
    %10 = vector.load %arg3[%c0_6, %c0_7] : memref<32x32xf32, #tpu.memory_space<vmem>>, vector<32x32xf32>
    %11 = arith.truncf %9 : vector<2x32xf32> to vector<2x32xbf16>
    %12 = arith.truncf %10 : vector<32x32xf32> to vector<32x32xbf16>
    %cst_8 = arith.constant dense<0.000000e+00> : vector<2x32xf32>
    %13 = tpu.matmul %11, %12, %cst_8 {dimension_numbers = #tpu.dot_dimension_numbers<[1], [0], [0], [1], [0, 0, 1, 1], [], []>} : vector<2x32xbf16>, vector<32x32xbf16>, vector<2x32xf32> -> vector<2x32xf32>
    %c0_9 = arith.constant 0 : index
    %c0_10 = arith.constant 0 : index
    %14 = vector.load %arg4[%c0_9, %c0_10] : memref<1x32xf32, #tpu.memory_space<vmem>>, vector<1x32xf32>
    %15 = vector.broadcast %14 : vector<1x32xf32> to vector<2x32xf32>
    %16 = arith.addf %13, %15 : vector<2x32xf32>
    %c0_11 = arith.constant 0 : index
    %c0_12 = arith.constant 0 : index
    %17 = vector.load %arg9[%c0_11, %c0_12] : memref<2x32xf32, #tpu.memory_space<vmem>>, vector<2x32xf32>
    tpu.vector_store %arg9[%c0_11, %c0_12], %16 {strides = array<i32>} : memref<2x32xf32, #tpu.memory_space<vmem>>, vector<2x32xf32>,
    %c0_13 = arith.constant 0 : index
    %c0_14 = arith.constant 0 : index
    %18 = vector.load %arg5[%c0_13, %c0_14] : memref<96x32xf32, #tpu.memory_space<vmem>>, vector<96x32xf32>
    %19 = arith.truncf %0 : vector<2x96xf32> to vector<2x96xbf16>
    %20 = arith.truncf %18 : vector<96x32xf32> to vector<96x32xbf16>
    %cst_15 = arith.constant dense<0.000000e+00> : vector<2x32xf32>
    %21 = tpu.matmul %19, %20, %cst_15 {dimension_numbers = #tpu.dot_dimension_numbers<[1], [0], [0], [1], [0, 0, 1, 1], [], []>} : vector<2x96xbf16>, vector<96x32xbf16>, vector<2x32xf32> -> vector<2x32xf32>
    %c0_16 = arith.constant 0 : index
    %c0_17 = arith.constant 0 : index
    %22 = vector.load %arg6[%c0_16, %c0_17] : memref<1x32xf32, #tpu.memory_space<vmem>>, vector<1x32xf32>
    %23 = vector.broadcast %22 : vector<1x32xf32> to vector<2x32xf32>
    %24 = arith.addf %21, %23 : vector<2x32xf32>
    %cst_18 = arith.constant 0.000000e+00 : f32
    %25 = vector.broadcast %cst_18 : f32 to vector<2x32xf32>
    %26 = arith.maximumf %24, %25 : vector<2x32xf32>
    %c0_19 = arith.constant 0 : index
    %c0_20 = arith.constant 0 : index
    %27 = vector.load %arg7[%c0_19, %c0_20] : memref<32x32xf32, #tpu.memory_space<vmem>>, vector<32x32xf32>
    %28 = arith.truncf %26 : vector<2x32xf32> to vector<2x32xbf16>
    %29 = arith.truncf %27 : vector<32x32xf32> to vector<32x32xbf16>
    %cst_21 = arith.constant dense<0.000000e+00> : vector<2x32xf32>
    %30 = tpu.matmul %28, %29, %cst_21 {dimension_numbers = #tpu.dot_dimension_numbers<[1], [0], [0], [1], [0, 0, 1, 1], [], []>} : vector<2x32xbf16>, vector<32x32xbf16>, vector<2x32xf32> -> vector<2x32xf32>
    %c0_22 = arith.constant 0 : index
    %c0_23 = arith.constant 0 : index
    %31 = vector.load %arg8[%c0_22, %c0_23] : memref<1x32xf32, #tpu.memory_space<vmem>>, vector<1x32xf32>
    %32 = vector.broadcast %31 : vector<1x32xf32> to vector<2x32xf32>
    %33 = arith.addf %30, %32 : vector<2x32xf32>
    %c0_24 = arith.constant 0 : index
    %c0_25 = arith.constant 0 : index
    %34 = vector.load %arg10[%c0_24, %c0_25] : memref<2x32xf32, #tpu.memory_space<vmem>>, vector<2x32xf32>
    tpu.vector_store %arg10[%c0_24, %c0_25], %33 {strides = array<i32>} : memref<2x32xf32, #tpu.memory_space<vmem>>, vector<2x32xf32>,
    return
  }
}

module attributes {stable_mosaic.version = 11 : i64} {
  func.func @_src_attn_sublayer_kernel(%arg0: i32, %arg1: memref<1x8x32xf32, #tpu.memory_space<vmem>>, %arg2: memref<1x8x32xf32, #tpu.memory_space<vmem>>, %arg3: memref<1x1x32xf32, #tpu.memory_space<vmem>>, %arg4: memref<1x1x32xf32, #tpu.memory_space<vmem>>, %arg5: memref<1x32xf32, #tpu.memory_space<vmem>>, %arg6: memref<1x32xf32, #tpu.memory_space<vmem>>, %arg7: memref<32x32xf32, #tpu.memory_space<vmem>>, %arg8: memref<1x32xf32, #tpu.memory_space<vmem>>, %arg9: memref<32x64xf32, #tpu.memory_space<vmem>>, %arg10: memref<1x64xf32, #tpu.memory_space<vmem>>, %arg11: memref<32x32xf32, #tpu.memory_space<vmem>>, %arg12: memref<1x32xf32, #tpu.memory_space<vmem>>, %arg13: memref<1x8x8xf32, #tpu.memory_space<vmem>>, %arg14: memref<1x8x32xf32, #tpu.memory_space<vmem>>) attributes {dimension_semantics = [#tpu.dimension_semantics<parallel>], iteration_bounds = array<i64: 2>, scalar_prefetch = 0 : i64, scratch_operands = 0 : i64, tpu.core_type = #tpu.core_type<tc>, window_params = [{transform_indices = @transform_0, window_bounds = array<i64: 1, 8, 32>}, {transform_indices = @transform_1, window_bounds = array<i64: 1, 8, 32>}, {transform_indices = @transform_2, window_bounds = array<i64: 1, 1, 32>}, {transform_indices = @transform_3, window_bounds = array<i64: 1, 1, 32>}, {pipeline_mode = #tpu.pipeline_mode<synchronous>, transform_indices = @transform_4, window_bounds = array<i64: 1, 32>}, {pipeline_mode = #tpu.pipeline_mode<synchronous>, transform_indices = @transform_5, window_bounds = array<i64: 1, 32>}, {pipeline_mode = #tpu.pipeline_mode<synchronous>, transform_indices = @transform_6, window_bounds = array<i64: 32, 32>}, {pipeline_mode = #tpu.pipeline_mode<synchronous>, transform_indices = @transform_7, window_bounds = array<i64: 1, 32>}, {pipeline_mode = #tpu.pipeline_mode<synchronous>, transform_indices = @transform_8, window_bounds = array<i64: 32, 64>}, {pipeline_mode = #tpu.pipeline_mode<synchronous>, transform_indices = @transform_9, window_bounds = array<i64: 1, 64>}, {pipeline_mode = #tpu.pipeline_mode<synchronous>, transform_indices = @transform_10, window_bounds = array<i64: 32, 32>}, {pipeline_mode = #tpu.pipeline_mode<synchronous>, transform_indices = @transform_11, window_bounds = array<i64: 1, 32>}, {transform_indices = @transform_12, window_bounds = array<i64: 1, 8, 8>}, {transform_indices = @transform_13, window_bounds = array<i64: 1, 8, 32>}]} {
    %c0 = arith.constant 0 : index
    %c0_0 = arith.constant 0 : index
    %c0_1 = arith.constant 0 : index
    %0 = vector.load %arg1[%c0, %c0_0, %c0_1] : memref<1x8x32xf32, #tpu.memory_space<vmem>>, vector<1x8x32xf32>
    %1 = vector.shape_cast %0 : vector<1x8x32xf32> to vector<8x32xf32>
    %c0_2 = arith.constant 0 : index
    %c0_3 = arith.constant 0 : index
    %c0_4 = arith.constant 0 : index
    %2 = vector.load %arg2[%c0_2, %c0_3, %c0_4] : memref<1x8x32xf32, #tpu.memory_space<vmem>>, vector<1x8x32xf32>
    %3 = vector.shape_cast %2 : vector<1x8x32xf32> to vector<8x32xf32>
    %c0_5 = arith.constant 0 : index
    %c0_6 = arith.constant 0 : index
    %c0_7 = arith.constant 0 : index
    %4 = vector.load %arg3[%c0_5, %c0_6, %c0_7] : memref<1x1x32xf32, #tpu.memory_space<vmem>>, vector<1x1x32xf32>
    %5 = vector.shape_cast %4 : vector<1x1x32xf32> to vector<1x32xf32>
    %c0_8 = arith.constant 0 : index
    %c0_9 = arith.constant 0 : index
    %c0_10 = arith.constant 0 : index
    %6 = vector.load %arg4[%c0_8, %c0_9, %c0_10] : memref<1x1x32xf32, #tpu.memory_space<vmem>>, vector<1x1x32xf32>
    %7 = vector.shape_cast %6 : vector<1x1x32xf32> to vector<1x32xf32>
    %c0_11 = arith.constant 0 : index
    %c0_12 = arith.constant 0 : index
    %8 = vector.load %arg5[%c0_11, %c0_12] : memref<1x32xf32, #tpu.memory_space<vmem>>, vector<1x32xf32>
    %c0_13 = arith.constant 0 : index
    %c0_14 = arith.constant 0 : index
    %9 = vector.load %arg6[%c0_13, %c0_14] : memref<1x32xf32, #tpu.memory_space<vmem>>, vector<1x32xf32>
    %cst = arith.constant dense<0.000000e+00> : vector<8xf32>
    %10 = vector.multi_reduction <add>, %1, %cst [1] : vector<8x32xf32> to vector<8xf32>
    %11 = vector.shape_cast %10 : vector<8xf32> to vector<8x1xf32>
    %cst_15 = arith.constant 3.200000e+01 : f32
    %12 = vector.broadcast %cst_15 : f32 to vector<8x1xf32>
    %13 = arith.divf %11, %12 : vector<8x1xf32>
    %14 = vector.broadcast %13 : vector<8x1xf32> to vector<8x32xf32>
    %15 = arith.subf %1, %14 : vector<8x32xf32>
    %16 = arith.mulf %15, %15 : vector<8x32xf32>
    %cst_16 = arith.constant dense<0.000000e+00> : vector<8xf32>
    %17 = vector.multi_reduction <add>, %16, %cst_16 [1] : vector<8x32xf32> to vector<8xf32>
    %18 = vector.shape_cast %17 : vector<8xf32> to vector<8x1xf32>
    %cst_17 = arith.constant 0.0322580636 : f32
    %19 = vector.broadcast %cst_17 : f32 to vector<8x1xf32>
    %20 = arith.mulf %18, %19 : vector<8x1xf32>
    %21 = math.sqrt %20 : vector<8x1xf32>
    %cst_18 = arith.constant 9.99999997E-7 : f32
    %22 = vector.broadcast %cst_18 : f32 to vector<8x1xf32>
    %23 = arith.addf %21, %22 : vector<8x1xf32>
    %24 = tpu.reciprocal %23 {approx = true} : vector<8x1xf32> -> vector<8x1xf32>
    %25 = arith.addf %8, %5 : vector<1x32xf32>
    %26 = vector.broadcast %25 : vector<1x32xf32> to vector<8x32xf32>
    %27 = arith.mulf %26, %15 : vector<8x32xf32>
    %28 = vector.broadcast %24 : vector<8x1xf32> to vector<8x32xf32>
    %29 = arith.mulf %27, %28 : vector<8x32xf32>
    %30 = arith.addf %9, %7 : vector<1x32xf32>
    %31 = vector.broadcast %30 : vector<1x32xf32> to vector<8x32xf32>
    %32 = arith.addf %29, %31 : vector<8x32xf32>
    %c0_19 = arith.constant 0 : index
    %c0_20 = arith.constant 0 : index
    %33 = vector.load %arg7[%c0_19, %c0_20] : memref<32x32xf32, #tpu.memory_space<vmem>>, vector<32x32xf32>
    %34 = arith.truncf %32 : vector<8x32xf32> to vector<8x32xbf16>
    %35 = arith.truncf %33 : vector<32x32xf32> to vector<32x32xbf16>
    %cst_21 = arith.constant dense<0.000000e+00> : vector<8x32xf32>
    %36 = tpu.matmul %34, %35, %cst_21 {dimension_numbers = #tpu.dot_dimension_numbers<[1], [0], [0], [1], [0, 0, 1, 1], [], []>} : vector<8x32xbf16>, vector<32x32xbf16>, vector<8x32xf32> -> vector<8x32xf32>
    %c0_22 = arith.constant 0 : index
    %c0_23 = arith.constant 0 : index
    %37 = vector.load %arg8[%c0_22, %c0_23] : memref<1x32xf32, #tpu.memory_space<vmem>>, vector<1x32xf32>
    %38 = vector.broadcast %37 : vector<1x32xf32> to vector<8x32xf32>
    %39 = arith.addf %36, %38 : vector<8x32xf32>
    %c0_24 = arith.constant 0 : index
    %c0_25 = arith.constant 0 : index
    %40 = vector.load %arg9[%c0_24, %c0_25] : memref<32x64xf32, #tpu.memory_space<vmem>>, vector<32x64xf32>
    %41 = arith.truncf %3 : vector<8x32xf32> to vector<8x32xbf16>
    %42 = arith.truncf %40 : vector<32x64xf32> to vector<32x64xbf16>
    %cst_26 = arith.constant dense<0.000000e+00> : vector<8x64xf32>
    %43 = tpu.matmul %41, %42, %cst_26 {dimension_numbers = #tpu.dot_dimension_numbers<[1], [0], [0], [1], [0, 0, 1, 1], [], []>} : vector<8x32xbf16>, vector<32x64xbf16>, vector<8x64xf32> -> vector<8x64xf32>
    %c0_27 = arith.constant 0 : index
    %c0_28 = arith.constant 0 : index
    %44 = vector.load %arg10[%c0_27, %c0_28] : memref<1x64xf32, #tpu.memory_space<vmem>>, vector<1x64xf32>
    %45 = vector.broadcast %44 : vector<1x64xf32> to vector<8x64xf32>
    %46 = arith.addf %43, %45 : vector<8x64xf32>
    %47 = vector.extract_strided_slice %46 {offsets = [0, 0], sizes = [8, 32], strides = [1, 1]} : vector<8x64xf32> to vector<8x32xf32>
    %48 = vector.extract_strided_slice %46 {offsets = [0, 32], sizes = [8, 32], strides = [1, 1]} : vector<8x64xf32> to vector<8x32xf32>
    %c0_29 = arith.constant 0 : index
    %c0_30 = arith.constant 0 : index
    %c0_31 = arith.constant 0 : index
    %49 = vector.load %arg13[%c0_29, %c0_30, %c0_31] : memref<1x8x8xf32, #tpu.memory_space<vmem>>, vector<1x8x8xf32>
    %50 = vector.shape_cast %49 : vector<1x8x8xf32> to vector<8x8xf32>
    %51 = vector.extract_strided_slice %39 {offsets = [0, 0], sizes = [8, 8], strides = [1, 1]} : vector<8x32xf32> to vector<8x8xf32>
    %cst_32 = arith.constant 0.353553385 : f32
    %52 = vector.broadcast %cst_32 : f32 to vector<8x8xf32>
    %53 = arith.mulf %51, %52 : vector<8x8xf32>
    %54 = vector.extract_strided_slice %47 {offsets = [0, 0], sizes = [8, 8], strides = [1, 1]} : vector<8x32xf32> to vector<8x8xf32>
    %55 = vector.extract_strided_slice %48 {offsets = [0, 0], sizes = [8, 8], strides = [1, 1]} : vector<8x32xf32> to vector<8x8xf32>
    %56 = arith.truncf %53 : vector<8x8xf32> to vector<8x8xbf16>
    %57 = arith.truncf %54 : vector<8x8xf32> to vector<8x8xbf16>
    %cst_33 = arith.constant dense<0.000000e+00> : vector<8x8xf32>
    %58 = tpu.matmul %56, %57, %cst_33 {dimension_numbers = #tpu.dot_dimension_numbers<[1], [1], [0], [0], [0, 0, 1, 0], [], []>} : vector<8x8xbf16>, vector<8x8xbf16>, vector<8x8xf32> -> vector<8x8xf32>
    %cst_34 = arith.constant 0.000000e+00 : f32
    %59 = vector.broadcast %cst_34 : f32 to vector<8x8xf32>
    %60 = arith.cmpf oeq, %50, %59 : vector<8x8xf32>
    %cst_35 = arith.constant -1.000000e+09 : f32
    %61 = vector.broadcast %cst_35 : f32 to vector<8x8xf32>
    %62 = arith.select %60, %61, %58 : vector<8x8xi1>, vector<8x8xf32>
    %cst_36 = arith.constant dense<0xFF800000> : vector<8xf32>
    %63 = vector.multi_reduction <maximumf>, %62, %cst_36 [1] : vector<8x8xf32> to vector<8xf32>
    %64 = vector.shape_cast %63 : vector<8xf32> to vector<8x1xf32>
    %65 = vector.broadcast %64 : vector<8x1xf32> to vector<8x8xf32>
    %66 = arith.subf %62, %65 : vector<8x8xf32>
    %67 = math.exp %66 : vector<8x8xf32>
    %cst_37 = arith.constant dense<0.000000e+00> : vector<8xf32>
    %68 = vector.multi_reduction <add>, %67, %cst_37 [1] : vector<8x8xf32> to vector<8xf32>
    %69 = vector.shape_cast %68 : vector<8xf32> to vector<8x1xf32>
    %70 = tpu.reciprocal %69 {approx = true} : vector<8x1xf32> -> vector<8x1xf32>
    %71 = vector.broadcast %70 : vector<8x1xf32> to vector<8x8xf32>
    %72 = arith.mulf %67, %71 : vector<8x8xf32>
    %73 = arith.truncf %72 : vector<8x8xf32> to vector<8x8xbf16>
    %74 = arith.truncf %55 : vector<8x8xf32> to vector<8x8xbf16>
    %cst_38 = arith.constant dense<0.000000e+00> : vector<8x8xf32>
    %75 = tpu.matmul %73, %74, %cst_38 {dimension_numbers = #tpu.dot_dimension_numbers<[1], [0], [0], [1], [0, 0, 1, 1], [], []>} : vector<8x8xbf16>, vector<8x8xbf16>, vector<8x8xf32> -> vector<8x8xf32>
    %76 = vector.extract_strided_slice %39 {offsets = [0, 8], sizes = [8, 8], strides = [1, 1]} : vector<8x32xf32> to vector<8x8xf32>
    %cst_39 = arith.constant 0.353553385 : f32
    %77 = vector.broadcast %cst_39 : f32 to vector<8x8xf32>
    %78 = arith.mulf %76, %77 : vector<8x8xf32>
    %79 = vector.extract_strided_slice %47 {offsets = [0, 8], sizes = [8, 8], strides = [1, 1]} : vector<8x32xf32> to vector<8x8xf32>
    %80 = vector.extract_strided_slice %48 {offsets = [0, 8], sizes = [8, 8], strides = [1, 1]} : vector<8x32xf32> to vector<8x8xf32>
    %81 = arith.truncf %78 : vector<8x8xf32> to vector<8x8xbf16>
    %82 = arith.truncf %79 : vector<8x8xf32> to vector<8x8xbf16>
    %cst_40 = arith.constant dense<0.000000e+00> : vector<8x8xf32>
    %83 = tpu.matmul %81, %82, %cst_40 {dimension_numbers = #tpu.dot_dimension_numbers<[1], [1], [0], [0], [0, 0, 1, 0], [], []>} : vector<8x8xbf16>, vector<8x8xbf16>, vector<8x8xf32> -> vector<8x8xf32>
    %cst_41 = arith.constant 0.000000e+00 : f32
    %84 = vector.broadcast %cst_41 : f32 to vector<8x8xf32>
    %85 = arith.cmpf oeq, %50, %84 : vector<8x8xf32>
    %cst_42 = arith.constant -1.000000e+09 : f32
    %86 = vector.broadcast %cst_42 : f32 to vector<8x8xf32>
    %87 = arith.select %85, %86, %83 : vector<8x8xi1>, vector<8x8xf32>
    %cst_43 = arith.constant dense<0xFF800000> : vector<8xf32>
    %88 = vector.multi_reduction <maximumf>, %87, %cst_43 [1] : vector<8x8xf32> to vector<8xf32>
    %89 = vector.shape_cast %88 : vector<8xf32> to vector<8x1xf32>
    %90 = vector.broadcast %89 : vector<8x1xf32> to vector<8x8xf32>
    %91 = arith.subf %87, %90 : vector<8x8xf32>
    %92 = math.exp %91 : vector<8x8xf32>
    %cst_44 = arith.constant dense<0.000000e+00> : vector<8xf32>
    %93 = vector.multi_reduction <add>, %92, %cst_44 [1] : vector<8x8xf32> to vector<8xf32>
    %94 = vector.shape_cast %93 : vector<8xf32> to vector<8x1xf32>
    %95 = tpu.reciprocal %94 {approx = true} : vector<8x1xf32> -> vector<8x1xf32>
    %96 = vector.broadcast %95 : vector<8x1xf32> to vector<8x8xf32>
    %97 = arith.mulf %92, %96 : vector<8x8xf32>
    %98 = arith.truncf %97 : vector<8x8xf32> to vector<8x8xbf16>
    %99 = arith.truncf %80 : vector<8x8xf32> to vector<8x8xbf16>
    %cst_45 = arith.constant dense<0.000000e+00> : vector<8x8xf32>
    %100 = tpu.matmul %98, %99, %cst_45 {dimension_numbers = #tpu.dot_dimension_numbers<[1], [0], [0], [1], [0, 0, 1, 1], [], []>} : vector<8x8xbf16>, vector<8x8xbf16>, vector<8x8xf32> -> vector<8x8xf32>
    %101 = vector.extract_strided_slice %39 {offsets = [0, 16], sizes = [8, 8], strides = [1, 1]} : vector<8x32xf32> to vector<8x8xf32>
    %cst_46 = arith.constant 0.353553385 : f32
    %102 = vector.broadcast %cst_46 : f32 to vector<8x8xf32>
    %103 = arith.mulf %101, %102 : vector<8x8xf32>
    %104 = vector.extract_strided_slice %47 {offsets = [0, 16], sizes = [8, 8], strides = [1, 1]} : vector<8x32xf32> to vector<8x8xf32>
    %105 = vector.extract_strided_slice %48 {offsets = [0, 16], sizes = [8, 8], strides = [1, 1]} : vector<8x32xf32> to vector<8x8xf32>
    %106 = arith.truncf %103 : vector<8x8xf32> to vector<8x8xbf16>
    %107 = arith.truncf %104 : vector<8x8xf32> to vector<8x8xbf16>
    %cst_47 = arith.constant dense<0.000000e+00> : vector<8x8xf32>
    %108 = tpu.matmul %106, %107, %cst_47 {dimension_numbers = #tpu.dot_dimension_numbers<[1], [1], [0], [0], [0, 0, 1, 0], [], []>} : vector<8x8xbf16>, vector<8x8xbf16>, vector<8x8xf32> -> vector<8x8xf32>
    %cst_48 = arith.constant 0.000000e+00 : f32
    %109 = vector.broadcast %cst_48 : f32 to vector<8x8xf32>
    %110 = arith.cmpf oeq, %50, %109 : vector<8x8xf32>
    %cst_49 = arith.constant -1.000000e+09 : f32
    %111 = vector.broadcast %cst_49 : f32 to vector<8x8xf32>
    %112 = arith.select %110, %111, %108 : vector<8x8xi1>, vector<8x8xf32>
    %cst_50 = arith.constant dense<0xFF800000> : vector<8xf32>
    %113 = vector.multi_reduction <maximumf>, %112, %cst_50 [1] : vector<8x8xf32> to vector<8xf32>
    %114 = vector.shape_cast %113 : vector<8xf32> to vector<8x1xf32>
    %115 = vector.broadcast %114 : vector<8x1xf32> to vector<8x8xf32>
    %116 = arith.subf %112, %115 : vector<8x8xf32>
    %117 = math.exp %116 : vector<8x8xf32>
    %cst_51 = arith.constant dense<0.000000e+00> : vector<8xf32>
    %118 = vector.multi_reduction <add>, %117, %cst_51 [1] : vector<8x8xf32> to vector<8xf32>
    %119 = vector.shape_cast %118 : vector<8xf32> to vector<8x1xf32>
    %120 = tpu.reciprocal %119 {approx = true} : vector<8x1xf32> -> vector<8x1xf32>
    %121 = vector.broadcast %120 : vector<8x1xf32> to vector<8x8xf32>
    %122 = arith.mulf %117, %121 : vector<8x8xf32>
    %123 = arith.truncf %122 : vector<8x8xf32> to vector<8x8xbf16>
    %124 = arith.truncf %105 : vector<8x8xf32> to vector<8x8xbf16>
    %cst_52 = arith.constant dense<0.000000e+00> : vector<8x8xf32>
    %125 = tpu.matmul %123, %124, %cst_52 {dimension_numbers = #tpu.dot_dimension_numbers<[1], [0], [0], [1], [0, 0, 1, 1], [], []>} : vector<8x8xbf16>, vector<8x8xbf16>, vector<8x8xf32> -> vector<8x8xf32>
    %126 = vector.extract_strided_slice %39 {offsets = [0, 24], sizes = [8, 8], strides = [1, 1]} : vector<8x32xf32> to vector<8x8xf32>
    %cst_53 = arith.constant 0.353553385 : f32
    %127 = vector.broadcast %cst_53 : f32 to vector<8x8xf32>
    %128 = arith.mulf %126, %127 : vector<8x8xf32>
    %129 = vector.extract_strided_slice %47 {offsets = [0, 24], sizes = [8, 8], strides = [1, 1]} : vector<8x32xf32> to vector<8x8xf32>
    %130 = vector.extract_strided_slice %48 {offsets = [0, 24], sizes = [8, 8], strides = [1, 1]} : vector<8x32xf32> to vector<8x8xf32>
    %131 = arith.truncf %128 : vector<8x8xf32> to vector<8x8xbf16>
    %132 = arith.truncf %129 : vector<8x8xf32> to vector<8x8xbf16>
    %cst_54 = arith.constant dense<0.000000e+00> : vector<8x8xf32>
    %133 = tpu.matmul %131, %132, %cst_54 {dimension_numbers = #tpu.dot_dimension_numbers<[1], [1], [0], [0], [0, 0, 1, 0], [], []>} : vector<8x8xbf16>, vector<8x8xbf16>, vector<8x8xf32> -> vector<8x8xf32>
    %cst_55 = arith.constant 0.000000e+00 : f32
    %134 = vector.broadcast %cst_55 : f32 to vector<8x8xf32>
    %135 = arith.cmpf oeq, %50, %134 : vector<8x8xf32>
    %cst_56 = arith.constant -1.000000e+09 : f32
    %136 = vector.broadcast %cst_56 : f32 to vector<8x8xf32>
    %137 = arith.select %135, %136, %133 : vector<8x8xi1>, vector<8x8xf32>
    %cst_57 = arith.constant dense<0xFF800000> : vector<8xf32>
    %138 = vector.multi_reduction <maximumf>, %137, %cst_57 [1] : vector<8x8xf32> to vector<8xf32>
    %139 = vector.shape_cast %138 : vector<8xf32> to vector<8x1xf32>
    %140 = vector.broadcast %139 : vector<8x1xf32> to vector<8x8xf32>
    %141 = arith.subf %137, %140 : vector<8x8xf32>
    %142 = math.exp %141 : vector<8x8xf32>
    %cst_58 = arith.constant dense<0.000000e+00> : vector<8xf32>
    %143 = vector.multi_reduction <add>, %142, %cst_58 [1] : vector<8x8xf32> to vector<8xf32>
    %144 = vector.shape_cast %143 : vector<8xf32> to vector<8x1xf32>
    %145 = tpu.reciprocal %144 {approx = true} : vector<8x1xf32> -> vector<8x1xf32>
    %146 = vector.broadcast %145 : vector<8x1xf32> to vector<8x8xf32>
    %147 = arith.mulf %142, %146 : vector<8x8xf32>
    %148 = arith.truncf %147 : vector<8x8xf32> to vector<8x8xbf16>
    %149 = arith.truncf %130 : vector<8x8xf32> to vector<8x8xbf16>
    %cst_59 = arith.constant dense<0.000000e+00> : vector<8x8xf32>
    %150 = tpu.matmul %148, %149, %cst_59 {dimension_numbers = #tpu.dot_dimension_numbers<[1], [0], [0], [1], [0, 0, 1, 1], [], []>} : vector<8x8xbf16>, vector<8x8xbf16>, vector<8x8xf32> -> vector<8x8xf32>
    %151 = tpu.concatenate %75, %100, %125, %150 in 1 : vector<8x8xf32>, vector<8x8xf32>, vector<8x8xf32>, vector<8x8xf32> -> vector<8x32xf32>
    %c0_60 = arith.constant 0 : index
    %c0_61 = arith.constant 0 : index
    %152 = vector.load %arg11[%c0_60, %c0_61] : memref<32x32xf32, #tpu.memory_space<vmem>>, vector<32x32xf32>
    %153 = arith.truncf %151 : vector<8x32xf32> to vector<8x32xbf16>
    %154 = arith.truncf %152 : vector<32x32xf32> to vector<32x32xbf16>
    %cst_62 = arith.constant dense<0.000000e+00> : vector<8x32xf32>
    %155 = tpu.matmul %153, %154, %cst_62 {dimension_numbers = #tpu.dot_dimension_numbers<[1], [0], [0], [1], [0, 0, 1, 1], [], []>} : vector<8x32xbf16>, vector<32x32xbf16>, vector<8x32xf32> -> vector<8x32xf32>
    %c0_63 = arith.constant 0 : index
    %c0_64 = arith.constant 0 : index
    %156 = vector.load %arg12[%c0_63, %c0_64] : memref<1x32xf32, #tpu.memory_space<vmem>>, vector<1x32xf32>
    %157 = vector.broadcast %156 : vector<1x32xf32> to vector<8x32xf32>
    %158 = arith.addf %155, %157 : vector<8x32xf32>
    %159 = arith.addf %1, %158 : vector<8x32xf32>
    %160 = vector.shape_cast %159 : vector<8x32xf32> to vector<1x8x32xf32>
    %c0_65 = arith.constant 0 : index
    %c0_66 = arith.constant 0 : index
    %c0_67 = arith.constant 0 : index
    %161 = vector.load %arg14[%c0_65, %c0_66, %c0_67] : memref<1x8x32xf32, #tpu.memory_space<vmem>>, vector<1x8x32xf32>
    tpu.vector_store %arg14[%c0_65, %c0_66, %c0_67], %160 {strides = array<i32>} : memref<1x8x32xf32, #tpu.memory_space<vmem>>, vector<1x8x32xf32>,
    return
  }
  func.func @transform_0(%arg0: i32) -> (i32, i32, i32) {
    %c0_i32 = arith.constant 0 : i32
    %c0_i32_0 = arith.constant 0 : i32
    %c0_i32_1 = arith.constant 0 : i32
    return %arg0, %c0_i32, %c0_i32_0 : i32, i32, i32
  }
  func.func @transform_1(%arg0: i32) -> (i32, i32, i32) {
    %c0_i32 = arith.constant 0 : i32
    %c0_i32_0 = arith.constant 0 : i32
    %c0_i32_1 = arith.constant 0 : i32
    return %arg0, %c0_i32, %c0_i32_0 : i32, i32, i32
  }
  func.func @transform_2(%arg0: i32) -> (i32, i32, i32) {
    %c0_i32 = arith.constant 0 : i32
    %c0_i32_0 = arith.constant 0 : i32
    %c0_i32_1 = arith.constant 0 : i32
    return %arg0, %c0_i32, %c0_i32_0 : i32, i32, i32
  }
  func.func @transform_3(%arg0: i32) -> (i32, i32, i32) {
    %c0_i32 = arith.constant 0 : i32
    %c0_i32_0 = arith.constant 0 : i32
    %c0_i32_1 = arith.constant 0 : i32
    return %arg0, %c0_i32, %c0_i32_0 : i32, i32, i32
  }
  func.func @transform_4(%arg0: i32) -> (i32, i32) {
    %c0_i32 = arith.constant 0 : i32
    %c0_i32_0 = arith.constant 0 : i32
    %c0_i32_1 = arith.constant 0 : i32
    return %c0_i32, %c0_i32_0 : i32, i32
  }
  func.func @transform_5(%arg0: i32) -> (i32, i32) {
    %c0_i32 = arith.constant 0 : i32
    %c0_i32_0 = arith.constant 0 : i32
    %c0_i32_1 = arith.constant 0 : i32
    return %c0_i32, %c0_i32_0 : i32, i32
  }
  func.func @transform_6(%arg0: i32) -> (i32, i32) {
    %c0_i32 = arith.constant 0 : i32
    %c0_i32_0 = arith.constant 0 : i32
    %c0_i32_1 = arith.constant 0 : i32
    return %c0_i32, %c0_i32_0 : i32, i32
  }
  func.func @transform_7(%arg0: i32) -> (i32, i32) {
    %c0_i32 = arith.constant 0 : i32
    %c0_i32_0 = arith.constant 0 : i32
    %c0_i32_1 = arith.constant 0 : i32
    return %c0_i32, %c0_i32_0 : i32, i32
  }
  func.func @transform_8(%arg0: i32) -> (i32, i32) {
    %c0_i32 = arith.constant 0 : i32
    %c0_i32_0 = arith.constant 0 : i32
    %c0_i32_1 = arith.constant 0 : i32
    return %c0_i32, %c0_i32_0 : i32, i32
  }
  func.func @transform_9(%arg0: i32) -> (i32, i32) {
    %c0_i32 = arith.constant 0 : i32
    %c0_i32_0 = arith.constant 0 : i32
    %c0_i32_1 = arith.constant 0 : i32
    return %c0_i32, %c0_i32_0 : i32, i32
  }
  func.func @transform_10(%arg0: i32) -> (i32, i32) {
    %c0_i32 = arith.constant 0 : i32
    %c0_i32_0 = arith.constant 0 : i32
    %c0_i32_1 = arith.constant 0 : i32
    return %c0_i32, %c0_i32_0 : i32, i32
  }
  func.func @transform_11(%arg0: i32) -> (i32, i32) {
    %c0_i32 = arith.constant 0 : i32
    %c0_i32_0 = arith.constant 0 : i32
    %c0_i32_1 = arith.constant 0 : i32
    return %c0_i32, %c0_i32_0 : i32, i32
  }
  func.func @transform_12(%arg0: i32) -> (i32, i32, i32) {
    %c0_i32 = arith.constant 0 : i32
    %c0_i32_0 = arith.constant 0 : i32
    %c0_i32_1 = arith.constant 0 : i32
    return %arg0, %c0_i32, %c0_i32_0 : i32, i32, i32
  }
  func.func @transform_13(%arg0: i32) -> (i32, i32, i32) {
    %c0_i32 = arith.constant 0 : i32
    %c0_i32_0 = arith.constant 0 : i32
    %c0_i32_1 = arith.constant 0 : i32
    return %arg0, %c0_i32, %c0_i32_0 : i32, i32, i32
  }
}

module attributes {stable_mosaic.version = 11 : i64} {
  func.func @_self_attn_sublayer_kernel(%arg0: i32, %arg1: memref<1x8x32xf32, #tpu.memory_space<vmem>>, %arg2: memref<1x1x32xf32, #tpu.memory_space<vmem>>, %arg3: memref<1x1x32xf32, #tpu.memory_space<vmem>>, %arg4: memref<1x32xf32, #tpu.memory_space<vmem>>, %arg5: memref<1x32xf32, #tpu.memory_space<vmem>>, %arg6: memref<32x96xf32, #tpu.memory_space<vmem>>, %arg7: memref<1x96xf32, #tpu.memory_space<vmem>>, %arg8: memref<32x32xf32, #tpu.memory_space<vmem>>, %arg9: memref<1x32xf32, #tpu.memory_space<vmem>>, %arg10: memref<1x8x8xf32, #tpu.memory_space<vmem>>, %arg11: memref<1x8x32xf32, #tpu.memory_space<vmem>>) attributes {dimension_semantics = [#tpu.dimension_semantics<parallel>], iteration_bounds = array<i64: 2>, scalar_prefetch = 0 : i64, scratch_operands = 0 : i64, tpu.core_type = #tpu.core_type<tc>, window_params = [{transform_indices = @transform_0, window_bounds = array<i64: 1, 8, 32>}, {transform_indices = @transform_1, window_bounds = array<i64: 1, 1, 32>}, {transform_indices = @transform_2, window_bounds = array<i64: 1, 1, 32>}, {pipeline_mode = #tpu.pipeline_mode<synchronous>, transform_indices = @transform_3, window_bounds = array<i64: 1, 32>}, {pipeline_mode = #tpu.pipeline_mode<synchronous>, transform_indices = @transform_4, window_bounds = array<i64: 1, 32>}, {pipeline_mode = #tpu.pipeline_mode<synchronous>, transform_indices = @transform_5, window_bounds = array<i64: 32, 96>}, {pipeline_mode = #tpu.pipeline_mode<synchronous>, transform_indices = @transform_6, window_bounds = array<i64: 1, 96>}, {pipeline_mode = #tpu.pipeline_mode<synchronous>, transform_indices = @transform_7, window_bounds = array<i64: 32, 32>}, {pipeline_mode = #tpu.pipeline_mode<synchronous>, transform_indices = @transform_8, window_bounds = array<i64: 1, 32>}, {transform_indices = @transform_9, window_bounds = array<i64: 1, 8, 8>}, {transform_indices = @transform_10, window_bounds = array<i64: 1, 8, 32>}]} {
    %c0 = arith.constant 0 : index
    %c0_0 = arith.constant 0 : index
    %c0_1 = arith.constant 0 : index
    %0 = vector.load %arg1[%c0, %c0_0, %c0_1] : memref<1x8x32xf32, #tpu.memory_space<vmem>>, vector<1x8x32xf32>
    %1 = vector.shape_cast %0 : vector<1x8x32xf32> to vector<8x32xf32>
    %c0_2 = arith.constant 0 : index
    %c0_3 = arith.constant 0 : index
    %c0_4 = arith.constant 0 : index
    %2 = vector.load %arg2[%c0_2, %c0_3, %c0_4] : memref<1x1x32xf32, #tpu.memory_space<vmem>>, vector<1x1x32xf32>
    %3 = vector.shape_cast %2 : vector<1x1x32xf32> to vector<1x32xf32>
    %c0_5 = arith.constant 0 : index
    %c0_6 = arith.constant 0 : index
    %c0_7 = arith.constant 0 : index
    %4 = vector.load %arg3[%c0_5, %c0_6, %c0_7] : memref<1x1x32xf32, #tpu.memory_space<vmem>>, vector<1x1x32xf32>
    %5 = vector.shape_cast %4 : vector<1x1x32xf32> to vector<1x32xf32>
    %c0_8 = arith.constant 0 : index
    %c0_9 = arith.constant 0 : index
    %6 = vector.load %arg4[%c0_8, %c0_9] : memref<1x32xf32, #tpu.memory_space<vmem>>, vector<1x32xf32>
    %c0_10 = arith.constant 0 : index
    %c0_11 = arith.constant 0 : index
    %7 = vector.load %arg5[%c0_10, %c0_11] : memref<1x32xf32, #tpu.memory_space<vmem>>, vector<1x32xf32>
    %cst = arith.constant dense<0.000000e+00> : vector<8xf32>
    %8 = vector.multi_reduction <add>, %1, %cst [1] : vector<8x32xf32> to vector<8xf32>
    %9 = vector.shape_cast %8 : vector<8xf32> to vector<8x1xf32>
    %cst_12 = arith.constant 3.200000e+01 : f32
    %10 = vector.broadcast %cst_12 : f32 to vector<8x1xf32>
    %11 = arith.divf %9, %10 : vector<8x1xf32>
    %12 = vector.broadcast %11 : vector<8x1xf32> to vector<8x32xf32>
    %13 = arith.subf %1, %12 : vector<8x32xf32>
    %14 = arith.mulf %13, %13 : vector<8x32xf32>
    %cst_13 = arith.constant dense<0.000000e+00> : vector<8xf32>
    %15 = vector.multi_reduction <add>, %14, %cst_13 [1] : vector<8x32xf32> to vector<8xf32>
    %16 = vector.shape_cast %15 : vector<8xf32> to vector<8x1xf32>
    %cst_14 = arith.constant 0.0322580636 : f32
    %17 = vector.broadcast %cst_14 : f32 to vector<8x1xf32>
    %18 = arith.mulf %16, %17 : vector<8x1xf32>
    %19 = math.sqrt %18 : vector<8x1xf32>
    %cst_15 = arith.constant 9.99999997E-7 : f32
    %20 = vector.broadcast %cst_15 : f32 to vector<8x1xf32>
    %21 = arith.addf %19, %20 : vector<8x1xf32>
    %22 = tpu.reciprocal %21 {approx = true} : vector<8x1xf32> -> vector<8x1xf32>
    %23 = arith.addf %6, %3 : vector<1x32xf32>
    %24 = vector.broadcast %23 : vector<1x32xf32> to vector<8x32xf32>
    %25 = arith.mulf %24, %13 : vector<8x32xf32>
    %26 = vector.broadcast %22 : vector<8x1xf32> to vector<8x32xf32>
    %27 = arith.mulf %25, %26 : vector<8x32xf32>
    %28 = arith.addf %7, %5 : vector<1x32xf32>
    %29 = vector.broadcast %28 : vector<1x32xf32> to vector<8x32xf32>
    %30 = arith.addf %27, %29 : vector<8x32xf32>
    %c0_16 = arith.constant 0 : index
    %c0_17 = arith.constant 0 : index
    %31 = vector.load %arg6[%c0_16, %c0_17] : memref<32x96xf32, #tpu.memory_space<vmem>>, vector<32x96xf32>
    %32 = arith.truncf %30 : vector<8x32xf32> to vector<8x32xbf16>
    %33 = arith.truncf %31 : vector<32x96xf32> to vector<32x96xbf16>
    %cst_18 = arith.constant dense<0.000000e+00> : vector<8x96xf32>
    %34 = tpu.matmul %32, %33, %cst_18 {dimension_numbers = #tpu.dot_dimension_numbers<[1], [0], [0], [1], [0, 0, 1, 1], [], []>} : vector<8x32xbf16>, vector<32x96xbf16>, vector<8x96xf32> -> vector<8x96xf32>
    %c0_19 = arith.constant 0 : index
    %c0_20 = arith.constant 0 : index
    %35 = vector.load %arg7[%c0_19, %c0_20] : memref<1x96xf32, #tpu.memory_space<vmem>>, vector<1x96xf32>
    %36 = vector.broadcast %35 : vector<1x96xf32> to vector<8x96xf32>
    %37 = arith.addf %34, %36 : vector<8x96xf32>
    %38 = vector.extract_strided_slice %37 {offsets = [0, 0], sizes = [8, 32], strides = [1, 1]} : vector<8x96xf32> to vector<8x32xf32>
    %39 = vector.extract_strided_slice %37 {offsets = [0, 32], sizes = [8, 32], strides = [1, 1]} : vector<8x96xf32> to vector<8x32xf32>
    %40 = vector.extract_strided_slice %37 {offsets = [0, 64], sizes = [8, 32], strides = [1, 1]} : vector<8x96xf32> to vector<8x32xf32>
    %c0_21 = arith.constant 0 : index
    %c0_22 = arith.constant 0 : index
    %c0_23 = arith.constant 0 : index
    %41 = vector.load %arg10[%c0_21, %c0_22, %c0_23] : memref<1x8x8xf32, #tpu.memory_space<vmem>>, vector<1x8x8xf32>
    %42 = vector.shape_cast %41 : vector<1x8x8xf32> to vector<8x8xf32>
    %43 = vector.extract_strided_slice %38 {offsets = [0, 0], sizes = [8, 8], strides = [1, 1]} : vector<8x32xf32> to vector<8x8xf32>
    %cst_24 = arith.constant 0.353553385 : f32
    %44 = vector.broadcast %cst_24 : f32 to vector<8x8xf32>
    %45 = arith.mulf %43, %44 : vector<8x8xf32>
    %46 = vector.extract_strided_slice %39 {offsets = [0, 0], sizes = [8, 8], strides = [1, 1]} : vector<8x32xf32> to vector<8x8xf32>
    %47 = vector.extract_strided_slice %40 {offsets = [0, 0], sizes = [8, 8], strides = [1, 1]} : vector<8x32xf32> to vector<8x8xf32>
    %48 = arith.truncf %45 : vector<8x8xf32> to vector<8x8xbf16>
    %49 = arith.truncf %46 : vector<8x8xf32> to vector<8x8xbf16>
    %cst_25 = arith.constant dense<0.000000e+00> : vector<8x8xf32>
    %50 = tpu.matmul %48, %49, %cst_25 {dimension_numbers = #tpu.dot_dimension_numbers<[1], [1], [0], [0], [0, 0, 1, 0], [], []>} : vector<8x8xbf16>, vector<8x8xbf16>, vector<8x8xf32> -> vector<8x8xf32>
    %cst_26 = arith.constant 0.000000e+00 : f32
    %51 = vector.broadcast %cst_26 : f32 to vector<8x8xf32>
    %52 = arith.cmpf oeq, %42, %51 : vector<8x8xf32>
    %cst_27 = arith.constant -1.000000e+09 : f32
    %53 = vector.broadcast %cst_27 : f32 to vector<8x8xf32>
    %54 = arith.select %52, %53, %50 : vector<8x8xi1>, vector<8x8xf32>
    %cst_28 = arith.constant dense<0xFF800000> : vector<8xf32>
    %55 = vector.multi_reduction <maximumf>, %54, %cst_28 [1] : vector<8x8xf32> to vector<8xf32>
    %56 = vector.shape_cast %55 : vector<8xf32> to vector<8x1xf32>
    %57 = vector.broadcast %56 : vector<8x1xf32> to vector<8x8xf32>
    %58 = arith.subf %54, %57 : vector<8x8xf32>
    %59 = math.exp %58 : vector<8x8xf32>
    %cst_29 = arith.constant dense<0.000000e+00> : vector<8xf32>
    %60 = vector.multi_reduction <add>, %59, %cst_29 [1] : vector<8x8xf32> to vector<8xf32>
    %61 = vector.shape_cast %60 : vector<8xf32> to vector<8x1xf32>
    %62 = tpu.reciprocal %61 {approx = true} : vector<8x1xf32> -> vector<8x1xf32>
    %63 = vector.broadcast %62 : vector<8x1xf32> to vector<8x8xf32>
    %64 = arith.mulf %59, %63 : vector<8x8xf32>
    %65 = arith.truncf %64 : vector<8x8xf32> to vector<8x8xbf16>
    %66 = arith.truncf %47 : vector<8x8xf32> to vector<8x8xbf16>
    %cst_30 = arith.constant dense<0.000000e+00> : vector<8x8xf32>
    %67 = tpu.matmul %65, %66, %cst_30 {dimension_numbers = #tpu.dot_dimension_numbers<[1], [0], [0], [1], [0, 0, 1, 1], [], []>} : vector<8x8xbf16>, vector<8x8xbf16>, vector<8x8xf32> -> vector<8x8xf32>
    %68 = vector.extract_strided_slice %38 {offsets = [0, 8], sizes = [8, 8], strides = [1, 1]} : vector<8x32xf32> to vector<8x8xf32>
    %cst_31 = arith.constant 0.353553385 : f32
    %69 = vector.broadcast %cst_31 : f32 to vector<8x8xf32>
    %70 = arith.mulf %68, %69 : vector<8x8xf32>
    %71 = vector.extract_strided_slice %39 {offsets = [0, 8], sizes = [8, 8], strides = [1, 1]} : vector<8x32xf32> to vector<8x8xf32>
    %72 = vector.extract_strided_slice %40 {offsets = [0, 8], sizes = [8, 8], strides = [1, 1]} : vector<8x32xf32> to vector<8x8xf32>
    %73 = arith.truncf %70 : vector<8x8xf32> to vector<8x8xbf16>
    %74 = arith.truncf %71 : vector<8x8xf32> to vector<8x8xbf16>
    %cst_32 = arith.constant dense<0.000000e+00> : vector<8x8xf32>
    %75 = tpu.matmul %73, %74, %cst_32 {dimension_numbers = #tpu.dot_dimension_numbers<[1], [1], [0], [0], [0, 0, 1, 0], [], []>} : vector<8x8xbf16>, vector<8x8xbf16>, vector<8x8xf32> -> vector<8x8xf32>
    %cst_33 = arith.constant 0.000000e+00 : f32
    %76 = vector.broadcast %cst_33 : f32 to vector<8x8xf32>
    %77 = arith.cmpf oeq, %42, %76 : vector<8x8xf32>
    %cst_34 = arith.constant -1.000000e+09 : f32
    %78 = vector.broadcast %cst_34 : f32 to vector<8x8xf32>
    %79 = arith.select %77, %78, %75 : vector<8x8xi1>, vector<8x8xf32>
    %cst_35 = arith.constant dense<0xFF800000> : vector<8xf32>
    %80 = vector.multi_reduction <maximumf>, %79, %cst_35 [1] : vector<8x8xf32> to vector<8xf32>
    %81 = vector.shape_cast %80 : vector<8xf32> to vector<8x1xf32>
    %82 = vector.broadcast %81 : vector<8x1xf32> to vector<8x8xf32>
    %83 = arith.subf %79, %82 : vector<8x8xf32>
    %84 = math.exp %83 : vector<8x8xf32>
    %cst_36 = arith.constant dense<0.000000e+00> : vector<8xf32>
    %85 = vector.multi_reduction <add>, %84, %cst_36 [1] : vector<8x8xf32> to vector<8xf32>
    %86 = vector.shape_cast %85 : vector<8xf32> to vector<8x1xf32>
    %87 = tpu.reciprocal %86 {approx = true} : vector<8x1xf32> -> vector<8x1xf32>
    %88 = vector.broadcast %87 : vector<8x1xf32> to vector<8x8xf32>
    %89 = arith.mulf %84, %88 : vector<8x8xf32>
    %90 = arith.truncf %89 : vector<8x8xf32> to vector<8x8xbf16>
    %91 = arith.truncf %72 : vector<8x8xf32> to vector<8x8xbf16>
    %cst_37 = arith.constant dense<0.000000e+00> : vector<8x8xf32>
    %92 = tpu.matmul %90, %91, %cst_37 {dimension_numbers = #tpu.dot_dimension_numbers<[1], [0], [0], [1], [0, 0, 1, 1], [], []>} : vector<8x8xbf16>, vector<8x8xbf16>, vector<8x8xf32> -> vector<8x8xf32>
    %93 = vector.extract_strided_slice %38 {offsets = [0, 16], sizes = [8, 8], strides = [1, 1]} : vector<8x32xf32> to vector<8x8xf32>
    %cst_38 = arith.constant 0.353553385 : f32
    %94 = vector.broadcast %cst_38 : f32 to vector<8x8xf32>
    %95 = arith.mulf %93, %94 : vector<8x8xf32>
    %96 = vector.extract_strided_slice %39 {offsets = [0, 16], sizes = [8, 8], strides = [1, 1]} : vector<8x32xf32> to vector<8x8xf32>
    %97 = vector.extract_strided_slice %40 {offsets = [0, 16], sizes = [8, 8], strides = [1, 1]} : vector<8x32xf32> to vector<8x8xf32>
    %98 = arith.truncf %95 : vector<8x8xf32> to vector<8x8xbf16>
    %99 = arith.truncf %96 : vector<8x8xf32> to vector<8x8xbf16>
    %cst_39 = arith.constant dense<0.000000e+00> : vector<8x8xf32>
    %100 = tpu.matmul %98, %99, %cst_39 {dimension_numbers = #tpu.dot_dimension_numbers<[1], [1], [0], [0], [0, 0, 1, 0], [], []>} : vector<8x8xbf16>, vector<8x8xbf16>, vector<8x8xf32> -> vector<8x8xf32>
    %cst_40 = arith.constant 0.000000e+00 : f32
    %101 = vector.broadcast %cst_40 : f32 to vector<8x8xf32>
    %102 = arith.cmpf oeq, %42, %101 : vector<8x8xf32>
    %cst_41 = arith.constant -1.000000e+09 : f32
    %103 = vector.broadcast %cst_41 : f32 to vector<8x8xf32>
    %104 = arith.select %102, %103, %100 : vector<8x8xi1>, vector<8x8xf32>
    %cst_42 = arith.constant dense<0xFF800000> : vector<8xf32>
    %105 = vector.multi_reduction <maximumf>, %104, %cst_42 [1] : vector<8x8xf32> to vector<8xf32>
    %106 = vector.shape_cast %105 : vector<8xf32> to vector<8x1xf32>
    %107 = vector.broadcast %106 : vector<8x1xf32> to vector<8x8xf32>
    %108 = arith.subf %104, %107 : vector<8x8xf32>
    %109 = math.exp %108 : vector<8x8xf32>
    %cst_43 = arith.constant dense<0.000000e+00> : vector<8xf32>
    %110 = vector.multi_reduction <add>, %109, %cst_43 [1] : vector<8x8xf32> to vector<8xf32>
    %111 = vector.shape_cast %110 : vector<8xf32> to vector<8x1xf32>
    %112 = tpu.reciprocal %111 {approx = true} : vector<8x1xf32> -> vector<8x1xf32>
    %113 = vector.broadcast %112 : vector<8x1xf32> to vector<8x8xf32>
    %114 = arith.mulf %109, %113 : vector<8x8xf32>
    %115 = arith.truncf %114 : vector<8x8xf32> to vector<8x8xbf16>
    %116 = arith.truncf %97 : vector<8x8xf32> to vector<8x8xbf16>
    %cst_44 = arith.constant dense<0.000000e+00> : vector<8x8xf32>
    %117 = tpu.matmul %115, %116, %cst_44 {dimension_numbers = #tpu.dot_dimension_numbers<[1], [0], [0], [1], [0, 0, 1, 1], [], []>} : vector<8x8xbf16>, vector<8x8xbf16>, vector<8x8xf32> -> vector<8x8xf32>
    %118 = vector.extract_strided_slice %38 {offsets = [0, 24], sizes = [8, 8], strides = [1, 1]} : vector<8x32xf32> to vector<8x8xf32>
    %cst_45 = arith.constant 0.353553385 : f32
    %119 = vector.broadcast %cst_45 : f32 to vector<8x8xf32>
    %120 = arith.mulf %118, %119 : vector<8x8xf32>
    %121 = vector.extract_strided_slice %39 {offsets = [0, 24], sizes = [8, 8], strides = [1, 1]} : vector<8x32xf32> to vector<8x8xf32>
    %122 = vector.extract_strided_slice %40 {offsets = [0, 24], sizes = [8, 8], strides = [1, 1]} : vector<8x32xf32> to vector<8x8xf32>
    %123 = arith.truncf %120 : vector<8x8xf32> to vector<8x8xbf16>
    %124 = arith.truncf %121 : vector<8x8xf32> to vector<8x8xbf16>
    %cst_46 = arith.constant dense<0.000000e+00> : vector<8x8xf32>
    %125 = tpu.matmul %123, %124, %cst_46 {dimension_numbers = #tpu.dot_dimension_numbers<[1], [1], [0], [0], [0, 0, 1, 0], [], []>} : vector<8x8xbf16>, vector<8x8xbf16>, vector<8x8xf32> -> vector<8x8xf32>
    %cst_47 = arith.constant 0.000000e+00 : f32
    %126 = vector.broadcast %cst_47 : f32 to vector<8x8xf32>
    %127 = arith.cmpf oeq, %42, %126 : vector<8x8xf32>
    %cst_48 = arith.constant -1.000000e+09 : f32
    %128 = vector.broadcast %cst_48 : f32 to vector<8x8xf32>
    %129 = arith.select %127, %128, %125 : vector<8x8xi1>, vector<8x8xf32>
    %cst_49 = arith.constant dense<0xFF800000> : vector<8xf32>
    %130 = vector.multi_reduction <maximumf>, %129, %cst_49 [1] : vector<8x8xf32> to vector<8xf32>
    %131 = vector.shape_cast %130 : vector<8xf32> to vector<8x1xf32>
    %132 = vector.broadcast %131 : vector<8x1xf32> to vector<8x8xf32>
    %133 = arith.subf %129, %132 : vector<8x8xf32>
    %134 = math.exp %133 : vector<8x8xf32>
    %cst_50 = arith.constant dense<0.000000e+00> : vector<8xf32>
    %135 = vector.multi_reduction <add>, %134, %cst_50 [1] : vector<8x8xf32> to vector<8xf32>
    %136 = vector.shape_cast %135 : vector<8xf32> to vector<8x1xf32>
    %137 = tpu.reciprocal %136 {approx = true} : vector<8x1xf32> -> vector<8x1xf32>
    %138 = vector.broadcast %137 : vector<8x1xf32> to vector<8x8xf32>
    %139 = arith.mulf %134, %138 : vector<8x8xf32>
    %140 = arith.truncf %139 : vector<8x8xf32> to vector<8x8xbf16>
    %141 = arith.truncf %122 : vector<8x8xf32> to vector<8x8xbf16>
    %cst_51 = arith.constant dense<0.000000e+00> : vector<8x8xf32>
    %142 = tpu.matmul %140, %141, %cst_51 {dimension_numbers = #tpu.dot_dimension_numbers<[1], [0], [0], [1], [0, 0, 1, 1], [], []>} : vector<8x8xbf16>, vector<8x8xbf16>, vector<8x8xf32> -> vector<8x8xf32>
    %143 = tpu.concatenate %67, %92, %117, %142 in 1 : vector<8x8xf32>, vector<8x8xf32>, vector<8x8xf32>, vector<8x8xf32> -> vector<8x32xf32>
    %c0_52 = arith.constant 0 : index
    %c0_53 = arith.constant 0 : index
    %144 = vector.load %arg8[%c0_52, %c0_53] : memref<32x32xf32, #tpu.memory_space<vmem>>, vector<32x32xf32>
    %145 = arith.truncf %143 : vector<8x32xf32> to vector<8x32xbf16>
    %146 = arith.truncf %144 : vector<32x32xf32> to vector<32x32xbf16>
    %cst_54 = arith.constant dense<0.000000e+00> : vector<8x32xf32>
    %147 = tpu.matmul %145, %146, %cst_54 {dimension_numbers = #tpu.dot_dimension_numbers<[1], [0], [0], [1], [0, 0, 1, 1], [], []>} : vector<8x32xbf16>, vector<32x32xbf16>, vector<8x32xf32> -> vector<8x32xf32>
    %c0_55 = arith.constant 0 : index
    %c0_56 = arith.constant 0 : index
    %148 = vector.load %arg9[%c0_55, %c0_56] : memref<1x32xf32, #tpu.memory_space<vmem>>, vector<1x32xf32>
    %149 = vector.broadcast %148 : vector<1x32xf32> to vector<8x32xf32>
    %150 = arith.addf %147, %149 : vector<8x32xf32>
    %151 = arith.addf %1, %150 : vector<8x32xf32>
    %152 = vector.shape_cast %151 : vector<8x32xf32> to vector<1x8x32xf32>
    %c0_57 = arith.constant 0 : index
    %c0_58 = arith.constant 0 : index
    %c0_59 = arith.constant 0 : index
    %153 = vector.load %arg11[%c0_57, %c0_58, %c0_59] : memref<1x8x32xf32, #tpu.memory_space<vmem>>, vector<1x8x32xf32>
    tpu.vector_store %arg11[%c0_57, %c0_58, %c0_59], %152 {strides = array<i32>} : memref<1x8x32xf32, #tpu.memory_space<vmem>>, vector<1x8x32xf32>,
    return
  }
  func.func @transform_0(%arg0: i32) -> (i32, i32, i32) {
    %c0_i32 = arith.constant 0 : i32
    %c0_i32_0 = arith.constant 0 : i32
    %c0_i32_1 = arith.constant 0 : i32
    return %arg0, %c0_i32, %c0_i32_0 : i32, i32, i32
  }
  func.func @transform_1(%arg0: i32) -> (i32, i32, i32) {
    %c0_i32 = arith.constant 0 : i32
    %c0_i32_0 = arith.constant 0 : i32
    %c0_i32_1 = arith.constant 0 : i32
    return %arg0, %c0_i32, %c0_i32_0 : i32, i32, i32
  }
  func.func @transform_2(%arg0: i32) -> (i32, i32, i32) {
    %c0_i32 = arith.constant 0 : i32
    %c0_i32_0 = arith.constant 0 : i32
    %c0_i32_1 = arith.constant 0 : i32
    return %arg0, %c0_i32, %c0_i32_0 : i32, i32, i32
  }
  func.func @transform_3(%arg0: i32) -> (i32, i32) {
    %c0_i32 = arith.constant 0 : i32
    %c0_i32_0 = arith.constant 0 : i32
    %c0_i32_1 = arith.constant 0 : i32
    return %c0_i32, %c0_i32_0 : i32, i32
  }
  func.func @transform_4(%arg0: i32) -> (i32, i32) {
    %c0_i32 = arith.constant 0 : i32
    %c0_i32_0 = arith.constant 0 : i32
    %c0_i32_1 = arith.constant 0 : i32
    return %c0_i32, %c0_i32_0 : i32, i32
  }
  func.func @transform_5(%arg0: i32) -> (i32, i32) {
    %c0_i32 = arith.constant 0 : i32
    %c0_i32_0 = arith.constant 0 : i32
    %c0_i32_1 = arith.constant 0 : i32
    return %c0_i32, %c0_i32_0 : i32, i32
  }
  func.func @transform_6(%arg0: i32) -> (i32, i32) {
    %c0_i32 = arith.constant 0 : i32
    %c0_i32_0 = arith.constant 0 : i32
    %c0_i32_1 = arith.constant 0 : i32
    return %c0_i32, %c0_i32_0 : i32, i32
  }
  func.func @transform_7(%arg0: i32) -> (i32, i32) {
    %c0_i32 = arith.constant 0 : i32
    %c0_i32_0 = arith.constant 0 : i32
    %c0_i32_1 = arith.constant 0 : i32
    return %c0_i32, %c0_i32_0 : i32, i32
  }
  func.func @transform_8(%arg0: i32) -> (i32, i32) {
    %c0_i32 = arith.constant 0 : i32
    %c0_i32_0 = arith.constant 0 : i32
    %c0_i32_1 = arith.constant 0 : i32
    return %c0_i32, %c0_i32_0 : i32, i32
  }
  func.func @transform_9(%arg0: i32) -> (i32, i32, i32) {
    %c0_i32 = arith.constant 0 : i32
    %c0_i32_0 = arith.constant 0 : i32
    %c0_i32_1 = arith.constant 0 : i32
    return %arg0, %c0_i32, %c0_i32_0 : i32, i32, i32
  }
  func.func @transform_10(%arg0: i32) -> (i32, i32, i32) {
    %c0_i32 = arith.constant 0 : i32
    %c0_i32_0 = arith.constant 0 : i32
    %c0_i32_1 = arith.constant 0 : i32
    return %arg0, %c0_i32, %c0_i32_0 : i32, i32, i32
  }
}

module attributes {stable_mosaic.version = 11 : i64} {
  func.func @_ffn_sublayer_kernel(%arg0: i32, %arg1: memref<1x8x32xf32, #tpu.memory_space<vmem>>, %arg2: memref<1x1x32xf32, #tpu.memory_space<vmem>>, %arg3: memref<1x1x32xf32, #tpu.memory_space<vmem>>, %arg4: memref<1x32xf32, #tpu.memory_space<vmem>>, %arg5: memref<1x32xf32, #tpu.memory_space<vmem>>, %arg6: memref<32x64xf32, #tpu.memory_space<vmem>>, %arg7: memref<1x64xf32, #tpu.memory_space<vmem>>, %arg8: memref<64x32xf32, #tpu.memory_space<vmem>>, %arg9: memref<1x32xf32, #tpu.memory_space<vmem>>, %arg10: memref<1x8x32xf32, #tpu.memory_space<vmem>>) attributes {dimension_semantics = [#tpu.dimension_semantics<parallel>], iteration_bounds = array<i64: 2>, scalar_prefetch = 0 : i64, scratch_operands = 0 : i64, tpu.core_type = #tpu.core_type<tc>, window_params = [{transform_indices = @transform_0, window_bounds = array<i64: 1, 8, 32>}, {transform_indices = @transform_1, window_bounds = array<i64: 1, 1, 32>}, {transform_indices = @transform_2, window_bounds = array<i64: 1, 1, 32>}, {pipeline_mode = #tpu.pipeline_mode<synchronous>, transform_indices = @transform_3, window_bounds = array<i64: 1, 32>}, {pipeline_mode = #tpu.pipeline_mode<synchronous>, transform_indices = @transform_4, window_bounds = array<i64: 1, 32>}, {pipeline_mode = #tpu.pipeline_mode<synchronous>, transform_indices = @transform_5, window_bounds = array<i64: 32, 64>}, {pipeline_mode = #tpu.pipeline_mode<synchronous>, transform_indices = @transform_6, window_bounds = array<i64: 1, 64>}, {pipeline_mode = #tpu.pipeline_mode<synchronous>, transform_indices = @transform_7, window_bounds = array<i64: 64, 32>}, {pipeline_mode = #tpu.pipeline_mode<synchronous>, transform_indices = @transform_8, window_bounds = array<i64: 1, 32>}, {transform_indices = @transform_9, window_bounds = array<i64: 1, 8, 32>}]} {
    %c0 = arith.constant 0 : index
    %c0_0 = arith.constant 0 : index
    %c0_1 = arith.constant 0 : index
    %0 = vector.load %arg1[%c0, %c0_0, %c0_1] : memref<1x8x32xf32, #tpu.memory_space<vmem>>, vector<1x8x32xf32>
    %1 = vector.shape_cast %0 : vector<1x8x32xf32> to vector<8x32xf32>
    %c0_2 = arith.constant 0 : index
    %c0_3 = arith.constant 0 : index
    %c0_4 = arith.constant 0 : index
    %2 = vector.load %arg2[%c0_2, %c0_3, %c0_4] : memref<1x1x32xf32, #tpu.memory_space<vmem>>, vector<1x1x32xf32>
    %3 = vector.shape_cast %2 : vector<1x1x32xf32> to vector<1x32xf32>
    %c0_5 = arith.constant 0 : index
    %c0_6 = arith.constant 0 : index
    %c0_7 = arith.constant 0 : index
    %4 = vector.load %arg3[%c0_5, %c0_6, %c0_7] : memref<1x1x32xf32, #tpu.memory_space<vmem>>, vector<1x1x32xf32>
    %5 = vector.shape_cast %4 : vector<1x1x32xf32> to vector<1x32xf32>
    %c0_8 = arith.constant 0 : index
    %c0_9 = arith.constant 0 : index
    %6 = vector.load %arg4[%c0_8, %c0_9] : memref<1x32xf32, #tpu.memory_space<vmem>>, vector<1x32xf32>
    %c0_10 = arith.constant 0 : index
    %c0_11 = arith.constant 0 : index
    %7 = vector.load %arg5[%c0_10, %c0_11] : memref<1x32xf32, #tpu.memory_space<vmem>>, vector<1x32xf32>
    %cst = arith.constant dense<0.000000e+00> : vector<8xf32>
    %8 = vector.multi_reduction <add>, %1, %cst [1] : vector<8x32xf32> to vector<8xf32>
    %9 = vector.shape_cast %8 : vector<8xf32> to vector<8x1xf32>
    %cst_12 = arith.constant 3.200000e+01 : f32
    %10 = vector.broadcast %cst_12 : f32 to vector<8x1xf32>
    %11 = arith.divf %9, %10 : vector<8x1xf32>
    %12 = vector.broadcast %11 : vector<8x1xf32> to vector<8x32xf32>
    %13 = arith.subf %1, %12 : vector<8x32xf32>
    %14 = arith.mulf %13, %13 : vector<8x32xf32>
    %cst_13 = arith.constant dense<0.000000e+00> : vector<8xf32>
    %15 = vector.multi_reduction <add>, %14, %cst_13 [1] : vector<8x32xf32> to vector<8xf32>
    %16 = vector.shape_cast %15 : vector<8xf32> to vector<8x1xf32>
    %cst_14 = arith.constant 0.0322580636 : f32
    %17 = vector.broadcast %cst_14 : f32 to vector<8x1xf32>
    %18 = arith.mulf %16, %17 : vector<8x1xf32>
    %19 = math.sqrt %18 : vector<8x1xf32>
    %cst_15 = arith.constant 9.99999997E-7 : f32
    %20 = vector.broadcast %cst_15 : f32 to vector<8x1xf32>
    %21 = arith.addf %19, %20 : vector<8x1xf32>
    %22 = tpu.reciprocal %21 {approx = true} : vector<8x1xf32> -> vector<8x1xf32>
    %23 = arith.addf %6, %3 : vector<1x32xf32>
    %24 = vector.broadcast %23 : vector<1x32xf32> to vector<8x32xf32>
    %25 = arith.mulf %24, %13 : vector<8x32xf32>
    %26 = vector.broadcast %22 : vector<8x1xf32> to vector<8x32xf32>
    %27 = arith.mulf %25, %26 : vector<8x32xf32>
    %28 = arith.addf %7, %5 : vector<1x32xf32>
    %29 = vector.broadcast %28 : vector<1x32xf32> to vector<8x32xf32>
    %30 = arith.addf %27, %29 : vector<8x32xf32>
    %c0_16 = arith.constant 0 : index
    %c0_17 = arith.constant 0 : index
    %31 = vector.load %arg6[%c0_16, %c0_17] : memref<32x64xf32, #tpu.memory_space<vmem>>, vector<32x64xf32>
    %32 = arith.truncf %30 : vector<8x32xf32> to vector<8x32xbf16>
    %33 = arith.truncf %31 : vector<32x64xf32> to vector<32x64xbf16>
    %cst_18 = arith.constant dense<0.000000e+00> : vector<8x64xf32>
    %34 = tpu.matmul %32, %33, %cst_18 {dimension_numbers = #tpu.dot_dimension_numbers<[1], [0], [0], [1], [0, 0, 1, 1], [], []>} : vector<8x32xbf16>, vector<32x64xbf16>, vector<8x64xf32> -> vector<8x64xf32>
    %c0_19 = arith.constant 0 : index
    %c0_20 = arith.constant 0 : index
    %35 = vector.load %arg7[%c0_19, %c0_20] : memref<1x64xf32, #tpu.memory_space<vmem>>, vector<1x64xf32>
    %36 = vector.broadcast %35 : vector<1x64xf32> to vector<8x64xf32>
    %37 = arith.addf %34, %36 : vector<8x64xf32>
    %cst_21 = arith.constant 0.000000e+00 : f32
    %38 = vector.broadcast %cst_21 : f32 to vector<8x64xf32>
    %39 = arith.maximumf %37, %38 : vector<8x64xf32>
    %c0_22 = arith.constant 0 : index
    %c0_23 = arith.constant 0 : index
    %40 = vector.load %arg8[%c0_22, %c0_23] : memref<64x32xf32, #tpu.memory_space<vmem>>, vector<64x32xf32>
    %41 = arith.truncf %39 : vector<8x64xf32> to vector<8x64xbf16>
    %42 = arith.truncf %40 : vector<64x32xf32> to vector<64x32xbf16>
    %cst_24 = arith.constant dense<0.000000e+00> : vector<8x32xf32>
    %43 = tpu.matmul %41, %42, %cst_24 {dimension_numbers = #tpu.dot_dimension_numbers<[1], [0], [0], [1], [0, 0, 1, 1], [], []>} : vector<8x64xbf16>, vector<64x32xbf16>, vector<8x32xf32> -> vector<8x32xf32>
    %c0_25 = arith.constant 0 : index
    %c0_26 = arith.constant 0 : index
    %44 = vector.load %arg9[%c0_25, %c0_26] : memref<1x32xf32, #tpu.memory_space<vmem>>, vector<1x32xf32>
    %45 = vector.broadcast %44 : vector<1x32xf32> to vector<8x32xf32>
    %46 = arith.addf %43, %45 : vector<8x32xf32>
    %47 = arith.addf %1, %46 : vector<8x32xf32>
    %48 = vector.shape_cast %47 : vector<8x32xf32> to vector<1x8x32xf32>
    %c0_27 = arith.constant 0 : index
    %c0_28 = arith.constant 0 : index
    %c0_29 = arith.constant 0 : index
    %49 = vector.load %arg10[%c0_27, %c0_28, %c0_29] : memref<1x8x32xf32, #tpu.memory_space<vmem>>, vector<1x8x32xf32>
    tpu.vector_store %arg10[%c0_27, %c0_28, %c0_29], %48 {strides = array<i32>} : memref<1x8x32xf32, #tpu.memory_space<vmem>>, vector<1x8x32xf32>,
    return
  }
  func.func @transform_0(%arg0: i32) -> (i32, i32, i32) {
    %c0_i32 = arith.constant 0 : i32
    %c0_i32_0 = arith.constant 0 : i32
    %c0_i32_1 = arith.constant 0 : i32
    return %arg0, %c0_i32, %c0_i32_0 : i32, i32, i32
  }
  func.func @transform_1(%arg0: i32) -> (i32, i32, i32) {
    %c0_i32 = arith.constant 0 : i32
    %c0_i32_0 = arith.constant 0 : i32
    %c0_i32_1 = arith.constant 0 : i32
    return %arg0, %c0_i32, %c0_i32_0 : i32, i32, i32
  }
  func.func @transform_2(%arg0: i32) -> (i32, i32, i32) {
    %c0_i32 = arith.constant 0 : i32
    %c0_i32_0 = arith.constant 0 : i32
    %c0_i32_1 = arith.constant 0 : i32
    return %arg0, %c0_i32, %c0_i32_0 : i32, i32, i32
  }
  func.func @transform_3(%arg0: i32) -> (i32, i32) {
    %c0_i32 = arith.constant 0 : i32
    %c0_i32_0 = arith.constant 0 : i32
    %c0_i32_1 = arith.constant 0 : i32
    return %c0_i32, %c0_i32_0 : i32, i32
  }
  func.func @transform_4(%arg0: i32) -> (i32, i32) {
    %c0_i32 = arith.constant 0 : i32
    %c0_i32_0 = arith.constant 0 : i32
    %c0_i32_1 = arith.constant 0 : i32
    return %c0_i32, %c0_i32_0 : i32, i32
  }
  func.func @transform_5(%arg0: i32) -> (i32, i32) {
    %c0_i32 = arith.constant 0 : i32
    %c0_i32_0 = arith.constant 0 : i32
    %c0_i32_1 = arith.constant 0 : i32
    return %c0_i32, %c0_i32_0 : i32, i32
  }
  func.func @transform_6(%arg0: i32) -> (i32, i32) {
    %c0_i32 = arith.constant 0 : i32
    %c0_i32_0 = arith.constant 0 : i32
    %c0_i32_1 = arith.constant 0 : i32
    return %c0_i32, %c0_i32_0 : i32, i32
  }
  func.func @transform_7(%arg0: i32) -> (i32, i32) {
    %c0_i32 = arith.constant 0 : i32
    %c0_i32_0 = arith.constant 0 : i32
    %c0_i32_1 = arith.constant 0 : i32
    return %c0_i32, %c0_i32_0 : i32, i32
  }
  func.func @transform_8(%arg0: i32) -> (i32, i32) {
    %c0_i32 = arith.constant 0 : i32
    %c0_i32_0 = arith.constant 0 : i32
    %c0_i32_1 = arith.constant 0 : i32
    return %c0_i32, %c0_i32_0 : i32, i32
  }
  func.func @transform_9(%arg0: i32) -> (i32, i32, i32) {
    %c0_i32 = arith.constant 0 : i32
    %c0_i32_0 = arith.constant 0 : i32
    %c0_i32_1 = arith.constant 0 : i32
    return %arg0, %c0_i32, %c0_i32_0 : i32, i32, i32
  }
}

</mosaic_0001>

<bundles_post_ra>
// kernel: decoder_layer.4
= control target key start
LH: loop header
LB: loop body
LE: loop exit
PB: predicated region body
PF: predicated region fallthrough
CT: control target
= control target key end

     0   :  { %vm59_vm0 = vcmask 785408   ;;  %vm88_vm1 = vcmask 261120   ;;  %vm105_vm2 = vcmask 254976   ;;  %s359_s5 = inlined_call_operand.vmem [shape: f32[96,32], index: 5, kind: input, shape index: {}]   ;;  %s360_s1 = inlined_call_operand.vmem [shape: f32[96,32], index: 1, kind: input, shape index: {}]   ;;  %s361_s2 = inlined_call_operand.vmem [shape: f32[1,32], index: 2, kind: input, shape index: {}]   ;;  %s362_s0 = inlined_call_operand.vmem [shape: f32[2,96], index: 0, kind: input, shape index: {}]   ;;  %s363_s6 = inlined_call_operand.vmem [shape: f32[1,32], index: 6, kind: input, shape index: {}]   ;;  %s364_s4 = inlined_call_operand.vmem [shape: f32[1,32], index: 4, kind: input, shape index: {}]   ;;  %s365_s3 = inlined_call_operand.vmem [shape: f32[32,32], index: 3, kind: input, shape index: {}]   ;;  %s366_s7 = inlined_call_operand.vmem [shape: f32[32,32], index: 7, kind: input, shape index: {}]   ;;  %s367_s8 = inlined_call_operand.vmem [shape: f32[1,32], index: 8, kind: input, shape index: {}]   ;;  %s368_s9 = inlined_call_operand.vmem [shape: f32[2,32], index: 9, kind: output, shape index: {0}]   ;;  %s369_s10 = inlined_call_operand.vmem [shape: f32[2,32], index: 10, kind: output, shape index: {1}]  }
   0x1   :  { %v117_v0 = vld [vmem:[%s359_s5 + $0x50] sm:$0xff]  ;;  %v118_v1 = vld [vmem:[%s359_s5 + $0x58] sm:$0xff]  ;;  %v115_v5 = vld [vmem:[%s359_s5 + $0x40] sm:$0xff] }
   0x2   :  { %v46_v2 = vld [vmem:[%s360_s1 + $0x50] sm:$0xff]  ;;  %v124_v3 = vpack.c.bf16 %v118_v1, %v117_v0  ;;  %v47_v4 = vld [vmem:[%s360_s1 + $0x58] sm:$0xff]  ;;  %v116_v6 = vld [vmem:[%s359_s5 + $0x48] sm:$0xff] }
   0x3   :  { %v54_v7 = vpack.c.bf16 %v47_v4, %v46_v2  ;;  %v44_v8 = vld [vmem:[%s360_s1 + $0x40] sm:$0xff]  ;;  %v45_v9 = vld [vmem:[%s360_s1 + $0x48] sm:$0xff]  ;;  %v123_v10 = vpack.c.bf16 %v116_v6, %v115_v5  ;;  %v113_v12 = vld [vmem:[%s359_s5 + $0x30] sm:$0xff] }
   0x4   :  { %131 = vmatpush.bf16.msra.mxu2 %v124_v3  ;;  %v53_v11 = vpack.c.bf16 %v45_v9, %v44_v8  ;;  %v114_v13 = vld [vmem:[%s359_s5 + $0x38] sm:$0xff]  ;;  %v42_v14 = vld [vmem:[%s360_s1 + $0x30] sm:$0xff]  ;;  %v111_v18 = vld [vmem:[%s359_s5 + $0x20] sm:$0xff] }
   0x5   :  { %65 = vmatpush.bf16.msra.mxu0 %v54_v7  ;;  %v43_v15 = vld [vmem:[%s360_s1 + $0x38] sm:$0xff]  ;;  %v122_v16 = vpack.c.bf16 %v114_v13, %v113_v12  ;;  %v112_v19 = vld [vmem:[%s359_s5 + $0x28] sm:$0xff]  ;;  %v40_v20 = vld [vmem:[%s360_s1 + $0x20] sm:$0xff] }
   0x6   :  { %v52_v17 = vpack.c.bf16 %v43_v15, %v42_v14  ;;  %v41_v21 = vld [vmem:[%s360_s1 + $0x28] sm:$0xff]  ;;  %v121_v22 = vpack.c.bf16 %v112_v19, %v111_v18  ;;  %v109_v24 = vld [vmem:[%s359_s5 + $0x10] sm:$0xff]  ;;  %v110_v25 = vld [vmem:[%s359_s5 + $0x18] sm:$0xff] }
   0x7   :  { %v51_v23 = vpack.c.bf16 %v41_v21, %v40_v20  ;;  %v38_v26 = vld [vmem:[%s360_s1 + $0x10] sm:$0xff]  ;;  %v39_v27 = vld [vmem:[%s360_s1 + $0x18] sm:$0xff]  ;;  %v120_v28 = vpack.c.bf16 %v110_v25, %v109_v24  ;;  %v107_v30 = vld [vmem:[%s359_s5] sm:$0xff] }
   0x8   :  { %132 = vmatpush.bf16.msra.mxu2 %v123_v10  ;;  %v50_v29 = vpack.c.bf16 %v39_v27, %v38_v26  ;;  %v108_v31 = vld [vmem:[%s359_s5 + $0x8] sm:$0xff]  ;;  %v36_v32 = vld [vmem:[%s360_s1] sm:$0xff]  ;;  %v79_v38 = vld [vmem:[%s365_s3 + $0x10] sm:$0xff] }
   0x9   :  { %66 = vmatpush.bf16.msra.mxu0 %v53_v11  ;;  %v37_v33 = vld [vmem:[%s360_s1 + $0x8] sm:$0xff]  ;;  %v119_v34 = vpack.c.bf16 %v108_v31, %v107_v30  ;;  %v35_v35 = vld [vmem:[%s362_s0] sm:$0x3]  ;;  %v80_v39 = vld [vmem:[%s365_s3 + $0x18] sm:$0xff] }
   0xa   :  { %v49_v36 = vpack.c.bf16 %v37_v33, %v36_v32  ;;  %v48_v37 = vpack.c.bf16 %v35_v35, %v35_v35  ;;  %v83_v40 = vpack.c.bf16 %v80_v39, %v79_v38  ;;  %v145_v41 = vld [vmem:[%s366_s7 + $0x10] sm:$0xff]  ;;  %v146_v42 = vld [vmem:[%s366_s7 + $0x18] sm:$0xff]  ;;  %v77_v44 = vld [vmem:[%s365_s3] sm:$0xff] }
   0xb   :  { %v149_v43 = vpack.c.bf16 %v146_v42, %v145_v41  ;;  %v78_v45 = vld [vmem:[%s365_s3 + $0x8] sm:$0xff]  ;;  %v143_v47 = vld [vmem:[%s366_s7] sm:$0xff] }
   0xc   :  { %133 = vmatpush.bf16.msra.mxu2 %v122_v16  ;;  %98 = vmatpush.bf16.msra.mxu1 %v83_v40  ;;  %v82_v46 = vpack.c.bf16 %v78_v45, %v77_v44  ;;  %v144_v48 = vld [vmem:[%s366_s7 + $0x8] sm:$0xff]  ;;  %v183_v50 = vld [vmem:[%s361_s2] ss:$0 sm:$0xff] }
   0xd   :  { %67 = vmatpush.bf16.msra.mxu0 %v52_v17  ;;  %163 = vmatpush.bf16.msra.mxu3 %v149_v43  ;;  %v148_v49 = vpack.c.bf16 %v144_v48, %v143_v47  ;;  %v184_v53 = vld [vmem:[%s363_s6] ss:$0 sm:$0xff] }
   0xe   :  { %v185_v62 = vld [vmem:[%s364_s4] ss:$0 sm:$0xff] }
   0xf   :  { %v186_v2 = vld [vmem:[%s367_s8] ss:$0 sm:$0xff] }
  0x10   :  { %134 = vmatpush.bf16.msra.mxu2 %v121_v22  ;;  %99 = vmatpush.bf16.msra.mxu1 %v82_v46 }
  0x11   :  { %68 = vmatpush.bf16.msra.mxu0 %v51_v23  ;;  %164 = vmatpush.bf16.msra.mxu3 %v148_v49 }
  0x14   :  { %135 = vmatpush.bf16.msra.mxu2 %v120_v28 }
  0x15   :  { %69 = vmatpush.bf16.msra.mxu0 %v50_v29 }
  0x18   :  { %136 = vmatpush.bf16.msra.mxu2 %v119_v34 }
  0x19   :  { %70 = vmatpush.bf16.msra.mxu0 %v49_v36 }
  0x1b   :  { %181 = vmatmul.msk.bf16.vlgmr.msra.gmra.mxu2 %vm59_vm0, %v48_v37 }
  0x1c   :  { %179 = vmatmul.msk.bf16.vlgmr.msra.gmra.mxu0 %vm59_vm0, %v48_v37 }
  0x99   :  { %v72_v51 = vpop.f32.mrf.mxu0 }
  0x9a   :  { %v73_v52 = vadd.f32 %v183_v50, %v72_v51 }
  0x9c   :  { %v76_v54 = vmax.f32 %v73_v52, 0.0 }
  0x9e   :  { %v81_v55 = vpack.c.bf16 %v76_v54, %v76_v54  ;;  %v138_v56 = vpop.f32.mrf.mxu2 }
  0x9f   :  { %v139_v57 = vadd.f32 %v184_v53, %v138_v56 }
  0xa0   :  { %180 = vmatmul.msk.bf16.vlgmr.msra.gmra.mxu1 %vm88_vm1, %v81_v55 }
  0xa1   :  { %v142_v58 = vmax.f32 %v139_v57, 0.0  ;;  %v74_v59 = vpop.f32.mrf.mxu0 }
  0xa3   :  { %v147_v60 = vpack.c.bf16 %v142_v58, %v142_v58 }
  0xa5   :  { %182 = vmatmul.msk.bf16.vlgmr.msra.gmra.mxu3 %vm88_vm1, %v147_v60 }
  0xa6   :  { %v140_v61 = vpop.f32.mrf.mxu2 }
 0x11d   :  { %v101_v63 = vpop.f32.mrf.mxu1 }
 0x11e   :  { %v102_v0 = vadd.f32 %v185_v62, %v101_v63 }
 0x120   :  { %106 = vst.msk [vmem:[%s368_s9] sm:$0x3] %vm105_vm2, %v102_v0 }
 0x125   :  { %v103_v1 = vpop.f32.mrf.mxu1 }
 0x128   :  { %v166_v3 = vpop.f32.mrf.mxu3 }
 0x129   :  { %v167_v4 = vadd.f32 %v186_v2, %v166_v3 }
 0x12b   :  { %170 = vst.msk [vmem:[%s369_s10] sm:$0x3] %vm105_vm2, %v167_v4 }
 0x130   :  { %v168_v5 = vpop.f32.mrf.mxu3 }

// kernel: decoder_layer.7
= control target key start
LH: loop header
LB: loop body
LE: loop exit
PB: predicated region body
PF: predicated region fallthrough
CT: control target
= control target key end

     0   :  { %14 = vsyncpa [#allocation3], 0  ;;  %s890_s0 = inlined_call_operand.vmem [shape: f32[2,8,32], index: 0, kind: input, shape index: {}]   ;;  %s891_s1 = inlined_call_operand.vmem [shape: f32[2,1,32], index: 1, kind: input, shape index: {}]   ;;  %s892_s2 = inlined_call_operand.vmem [shape: f32[2,1,32], index: 2, kind: input, shape index: {}]   ;;  %s893_s3 = inlined_call_operand.vmem [shape: f32[1,32], index: 3, kind: input, shape index: {}]   ;;  %s894_s4 = inlined_call_operand.vmem [shape: f32[1,32], index: 4, kind: input, shape index: {}]   ;;  %s895_s5 = inlined_call_operand.vmem [shape: f32[32,64], index: 5, kind: input, shape index: {}]   ;;  %s896_s6 = inlined_call_operand.vmem [shape: f32[1,64], index: 6, kind: input, shape index: {}]   ;;  %s897_s7 = inlined_call_operand.vmem [shape: f32[64,32], index: 7, kind: input, shape index: {}]   ;;  %s898_s8 = inlined_call_operand.vmem [shape: f32[1,32], index: 8, kind: input, shape index: {}]   ;;  %s899_s9 = inlined_call_operand.hbm [shape: f32[2,8,32], index: 9, kind: output, shape index: {}]  }
   0x1   :  { %16 = vsyncpa [#allocation3 + $0x1], 0  ;;  %s737_s30 = smov 0   ;;  %s739_s10 = smov 0  }
   0x2   :  { %s741_s11 = smov 0   ;;  %s743_s12 = smov 0  }
   0x3 LB: > { %s758_s13 = sadd.s32 4294967295, %s684_s12   ;;  %s562_s14 = sadd.s32 4294967294, %s684_s12   ;;  %s684_s12 = sphi %s743_s12, %s905_s12   ;;  %s680_s11 = sphi %s741_s11, %s904_s11   ;;  %s676_s10 = sphi %s739_s10, %s903_s10   ;;  %s672_s30 = sphi %s737_s30, %s902_s30  }
   0x4   : > { %s762_s15 = sadd.s32 1, %s684_s12   ;;  %s233_s16 = sadd.s32 1, %s680_s11 }
   0x5   : > { %s230_s17 = ssub.s32 %s684_s12, %s762_s15  ;;  %p243_p0 = scmp.ne.s32.totalorder %s680_s11, %s676_s10 }
   0x6   : > { %p231_p1 = scmp.eq.s32.totalorder %s230_s17, 0  ;;  %p244_p2 = scmp.eq.s32.totalorder %s758_s13, 1 }
   0x7   : > { %p249_p3 = scmp.ne.s32.totalorder %s676_s10, %s672_s30  ;;  %p250_p4 = scmp.eq.s32.totalorder %s562_s14, 1 }
   0x8   : > { %s773_s18 = scalar_select %p231_p1, %s680_s11, %s233_s16  }
   0x9   : > { %p775_p5 = por %p244_p2, %p243_p0  ;;  %p779_p6 = por %p250_p4, %p249_p3 }
   0xa   : > { %p565_p7 = scmp.ge.s32.totalorder %s684_s12, 1  ;;  %p305_p8 = scmp.lt.s32.totalorder %s684_s12, 3 }
   0xc   : > { %p306_p9 = pnand %p565_p7, %p305_p8 }
   0xd   : > { %p346_p10 = scmp.lt.s32.totalorder (!%p306_p9), %s758_s13, 1  ;;  %s343_s28 = sand.u32 (!%p306_p9), 1, %s676_s10  }
   0xe   : > { %309 = sbr.rel (%p306_p9) target bundleno = 568 (0x238), region = 56  ;;  %s566_s29 = sshll.u32 (!%p306_p9), %s343_s28, 3 }
   0xf   : > { %s345_s24 = scalar_lea.vmem (!%p306_p9), [#allocation2], %s566_s29  ;;  %s642_s29 = scalar_lea.hbm (!%p306_p9), %s899_s9, 16 }
  0x13   : > { %s787_s21 = scalar_select %p346_p10, %s758_s13, 1  ;;  %vm362_vm0 = vcmask 261120   ;;  %v686_v2 = vmov 32.0   ;;  %v407_v14 = vld [vmem:[%s895_s5 + $0x10] sm:$0xff]  ;;  %v408_v15 = vld [vmem:[%s895_s5 + $0x18] sm:$0xff]  ;;  %v405_v16 = vld [vmem:[%s895_s5] sm:$0xff] }
  0x14   : > { %616 = vrcp.f32 %v686_v2  ;;  %v411_v17 = vpack.c.bf16 %v408_v15, %v407_v14  ;;  %v406_v18 = vld [vmem:[%s895_s5 + $0x8] sm:$0xff]  ;;  %v439_v22 = vld [vmem:[%s897_s7 + $0x30] sm:$0xff]  ;;  %v440_v23 = vld [vmem:[%s897_s7 + $0x38] sm:$0xff]  ;;  %vm450_vm4 = vcmask 523264  }
  0x15   : > { %s567_s22 = sshll.u32 %s787_s21, 3  ;;  %v410_v19 = vpack.c.bf16 %v406_v18, %v405_v16  ;;  %v437_v24 = vld [vmem:[%s897_s7 + $0x20] sm:$0xff]  ;;  %v445_v25 = vpack.c.bf16 %v440_v23, %v439_v22  ;;  %v438_v26 = vld [vmem:[%s897_s7 + $0x28] sm:$0xff]  ;;  %s355_s27 = scalar_lea.vmem %s892_s2, %s787_s21  ;;  %v435_v52 = vld [vmem:[%s897_s7 + $0x10] sm:$0xff] }
  0x16   : > { %s349_s25 = scalar_lea.vmem %s890_s0, %s567_s22  ;;  %425 = vmatpush.bf16.msra.mxu0 %v411_v17  ;;  %v444_v29 = vpack.c.bf16 %v438_v26, %v437_v24  ;;  %s352_s22 = scalar_lea.vmem %s891_s1, %s787_s21  ;;  %v360_v35 = vld [vmem:[%s893_s3] sm:$0x1]  ;;  %v436_v53 = vld [vmem:[%s897_s7 + $0x18] sm:$0xff]  ;;  %v434_v56 = vld [vmem:[%s897_s7 + $0x8] sm:$0xff] }
  0x17   : > { %v793_v0 = vld [vmem:[%s349_s25] sm:$0xff]  ;;  %458 = vmatpush.bf16.msra.mxu1 %v445_v25  ;;  %v443_v54 = vpack.c.bf16 %v436_v53, %v435_v52  ;;  %s571_s21 = sshll.u32 %s758_s13, 3  ;;  %s482_s25 = sshll.u32 %s345_s24, 4  ;;  %s483_s25 = int_to_ptr.vmem [resolvable:$true] %s482_s25 }
  0x18   : > { %v363_v1 = vsel %vm362_vm0, %v793_v0, 0.0  ;;  %v358_v34 = vld [vmem:[%s352_s22] sm:$0x1]  ;;  %s480_s23 = scalar_lea.hbm %s899_s9, %s571_s21  ;;  %s470_s13 = scalar_lea.sflag [#allocation3], %s343_s28 }
  0x19   : > { %364 = vadd.xlane.f32.xlu0 %v363_v1  ;;  %v394_v39 = vadd.f32 %v360_v35, %v358_v34  ;;  %v359_v41 = vld [vmem:[%s355_s27] sm:$0x1]  ;;  %s484_s26 = sshll.u32 %s480_s23, 4  ;;  %s485_s26 = int_to_ptr.hbm [resolvable:$true] %s484_s26 }
  0x1a   : > { %v617_v3 = vpop.eup %616  ;;  %426 = vmatpush.bf16.msra.mxu0 %v410_v19  ;;  %v361_v42 = vld [vmem:[%s894_s4] sm:$0x1]  ;;  %s636_s27 = sshra.s32 %s485_s26, 4  ;;  %s637_s27 = int_to_ptr.hbm [resolvable:$true] %s636_s27 }
  0x1b   : > { %v367_v4 = vmul.f32 32.0, %v617_v3  ;;  %vm371_vm1 = vweird.f32 %v617_v3  ;;  %459 = vmatpush.bf16.msra.mxu1 %v444_v29  ;;  %v396_v44 = vperm.slane %v394_v39, 0  ;;  %v400_v45 = vadd.f32 %v361_v42, %v359_v41  ;;  %v433_v55 = vld [vmem:[%s897_s7] sm:$0xff]  ;;  %s638_s14 = scalar_lea.hbm %s637_s27, 8  ;;  %p643_p0 = scmp.lt.s32.totalorder %s637_s27, %s899_s9 }
  0x1c   : > { %v442_v57 = vpack.c.bf16 %v434_v56, %v433_v55  ;;  %v614_v58 = vld [vmem:[%s896_s6] ss:$0 sm:$0xff]  ;;  %p639_p11 = scmp.ne.s32.totalorder %s637_s27, %s638_s14  ;;  %p644_p1 = scmp.lt.s32.totalorder %s642_s29, %s638_s14 }
  0x1d   : > { %v368_v5 = vsub.f32 1.0, %v367_v4  ;;  %v402_v47 = vperm.slane %v400_v45, 0  ;;  %v615_v1 = vld [vmem:[%s898_s8] ss:$0 sm:$0xff] }
  0x1e   : > { %p640_p12 = pnand %p639_p11, %p775_p5  ;;  %p645_p2 = por %p644_p1, %p643_p0 }
  0x1f   : > { %v369_v6 = vmul.f32 %v617_v3, %v368_v5  ;;  %460 = vmatpush.bf16.msra.mxu1 %v443_v54 }
  0x20   : > { %p641_p13 = pneg %p640_p12 }
  0x21   : > { %v370_v7 = vadd.f32 %v617_v3, %v369_v6 }
  0x22   : > { %p646_p3 = pnand %p645_p2, %p641_p13 }
  0x23   : > { %v372_v8 = vsel %vm371_vm1, %v617_v3, %v370_v7  ;;  %461 = vmatpush.bf16.msra.mxu1 %v442_v57 }
  0x8c   : > { %v365_v9 = vpop.xlane.xlu0 %364 }
  0x8d   : > { %v373_v10 = vmul.f32 %v372_v8, %v365_v9 }
  0x8f   : > { %v374_v11 = vsub.f32 %v793_v0, %v373_v10 }
  0x91   : > { %v375_v12 = vmul.f32 %v374_v11, %v374_v11  ;;  %v398_v46 = vmul.f32 %v396_v44, %v374_v11 }
  0x93   : > { %v376_v13 = vsel %vm362_vm0, %v375_v12, 0.0 }
  0x94   : > { %377 = vadd.xlane.f32.xlu0 %v376_v13 }
 0x107   : > { %v378_v20 = vpop.xlane.xlu0 %377 }
 0x108   : > { %v379_v21 = vmul.f32 0.032258064, %v378_v20 }
 0x10a   : > { %618 = vrsqrt.f32 %v379_v21  ;;  %vm387_vm2 = vcmp.eq.f32.partialorder %v379_v21, inf  ;;  %v390_v37 = vand.u32 2147483648, %v379_v21  ;;  %vm389_vm3 = vcmp.eq.f32.partialorder %v379_v21, 0.0 }
 0x110   : > { %v619_v27 = vpop.eup %618 }
 0x111   : > { %v381_v28 = vmul.f32 %v619_v27, %v379_v21 }
 0x113   : > { %v382_v30 = vmul.f32 %v619_v27, %v381_v28 }
 0x115   : > { %v383_v31 = vmul.f32 0.5, %v382_v30 }
 0x117   : > { %v384_v32 = vsub.f32 1.5, %v383_v31 }
 0x119   : > { %v385_v33 = vmul.f32 %v619_v27, %v384_v32 }
 0x11b   : > { %v386_v36 = vmul.f32 %v385_v33, %v379_v21 }
 0x11d   : > { %v388_v38 = vsel %vm387_vm2, %v379_v21, %v386_v36 }
 0x11e   : > { %v391_v40 = vsel %vm389_vm3, %v390_v37, %v388_v38 }
 0x11f   : > { %v392_v43 = vadd.f32 1e-06, %v391_v40 }
 0x121   : > { %620 = vrcp.f32 %v392_v43 }
 0x127   : > { %v621_v48 = vpop.eup %620 }
 0x128   : > { %v399_v49 = vmul.f32 %v621_v48, %v398_v46 }
 0x12a   : > { %v404_v50 = vadd.f32 %v402_v47, %v399_v49 }
 0x12c   : > { %v409_v51 = vpack.c.bf16 %v404_v50, %v404_v50 }
 0x12e   : > { %568 = vmatmul.msk.bf16.vlgmr.msra.gmra.mxu0 %vm362_vm0, %v409_v51 }
 0x1ab   : > { %v428_v59 = vpop.f32.mrf.mxu0 }
 0x1ac   : > { %v429_v60 = vadd.f32 %v614_v58, %v428_v59 }
 0x1ae   : > { %v432_v61 = vmax.f32 %v429_v60, 0.0 }
 0x1b0   : > { %v441_v62 = vpack.c.bf16 %v432_v61, %v432_v61 }
 0x1b2   : > { %569 = vmatmul.msk.bf16.vlgmr.msra.gmra.mxu1 %vm450_vm4, %v441_v62 }
 0x1b3   : > { %v430_v63 = vpop.f32.mrf.mxu0 }
 0x22f   : > { %v463_v2 = vpop.f32.mrf.mxu1 }
 0x230   : > { %v464_v3 = vadd.f32 %v615_v1, %v463_v2 }
 0x232   : > { %v467_v4 = vadd.f32 %v464_v3, %v793_v0 }
 0x234   : > { %468 = vst.msk [vmem:[%s345_s24] sm:$0xff] %vm362_vm0, %v467_v4 }
 0x235   : > { %649 = shalt.err (!%p646_p3)
}
 0x236   : > { %574 = dma.vmem_to_hbm [thread:$0]  (%p775_p5), %s483_s25, 128, %s485_s26, %s470_s13  }
 0x237   : > { %v465_v0 = vpop.f32.mrf.mxu1 }
 0x238 PF: > { %p580_p4 = scmp.ge.s32.totalorder %s684_s12, 2  ;;  %s496_s28 = sand.u32 1, %s672_s30  }
 0x239   : > { %s497_s23 = scalar_lea.sflag [#allocation3], %s496_s28 }
 0x23a   : > { %p577_p7 = pnand %p580_p4, %p779_p6 }
 0x23c   : > { %p578_p8 = pneg %p577_p7 }
 0x23e   : > { %667 = dma.done.wait (%p578_p8), %s497_s23, 128  }
 0x23f   : > { %669 = vsyncadd (%p578_p8), %s497_s23, 4294967168  ;;  %p19_p9 = scmp.ge.s32.totalorder %s762_s15, 4   ;;  %s902_s30 = smov %s676_s10 }
 0x240   : > { %s903_s10 = smov %s680_s11  ;;  %s904_s11 = smov %s773_s18 }
 0x241   : > { %s905_s12 = smov %s762_s15  ;;  %21 = sbr.rel (!%p19_p9) target bundleno = 3 (0x3), region = 97 }
 0x246   :  { %503 = vsyncpa [#allocation3], 1 }
 0x247   :  { %505 = vsyncpa [#allocation3 + $0x1], 1 }

// kernel: decoder_layer.6
= control target key start
LH: loop header
LB: loop body
LE: loop exit
PB: predicated region body
PF: predicated region fallthrough
CT: control target
= control target key end

     0   :  { %s1782_s0 = inlined_call_operand.vmem [shape: f32[2,8,32], index: 0, kind: input, shape index: {}]   ;;  %s1783_s1 = inlined_call_operand.hbm [shape: f32[2,8,32], index: 1, kind: input, shape index: {}]   ;;  %s1784_s2 = inlined_call_operand.vmem [shape: f32[2,1,32], index: 2, kind: input, shape index: {}]   ;;  %s1785_s3 = inlined_call_operand.vmem [shape: f32[2,1,32], index: 3, kind: input, shape index: {}]   ;;  %s1786_s4 = inlined_call_operand.vmem [shape: f32[1,32], index: 4, kind: input, shape index: {}]   ;;  %s1787_s5 = inlined_call_operand.hbm [shape: f32[1,32], index: 5, kind: input, shape index: {}]   ;;  %s1788_s6 = inlined_call_operand.vmem [shape: f32[32,32], index: 6, kind: input, shape index: {}]   ;;  %s1789_s7 = inlined_call_operand.hbm [shape: f32[1,32], index: 7, kind: input, shape index: {}]   ;;  %s1790_s8 = inlined_call_operand.vmem [shape: f32[32,64], index: 8, kind: input, shape index: {}]   ;;  %s1791_s9 = inlined_call_operand.hbm [shape: f32[1,64], index: 9, kind: input, shape index: {}]   ;;  %s1792_s10 = inlined_call_operand.vmem [shape: f32[32,32], index: 10, kind: input, shape index: {}]   ;;  %s1793_s11 = inlined_call_operand.hbm [shape: f32[1,32], index: 11, kind: input, shape index: {}]   ;;  %s1794_s12 = inlined_call_operand.vmem [shape: f32[2,8,8], index: 12, kind: input, shape index: {}]   ;;  %s1795_s13 = inlined_call_operand.vmem [shape: f32[2,8,32], index: 13, kind: output, shape index: {}]  }
   0x1   :  { %1796 = sst [smem:[#allocation13_spill]] %s1787_s5 }
   0x2   :  { %1797 = sst [smem:[#allocation14_spill]] %s1789_s7 }
   0x3   :  { %1798 = sst [smem:[#allocation15_spill]] %s1791_s9 }
   0x4   :  { %18 = vsyncpa [#allocation3], 0 }
   0x5   :  { %20 = vsyncpa [#allocation3 + $0x1], 0 }
   0x6   :  { %21 = vsyncpa [#allocation5], 0 }
   0x7   :  { %22 = vsyncpa [#allocation8], 0  ;;  %s1532_s25 = smov 0   ;;  %s1534_s26 = smov 0  }
   0x8   :  { %s1536_s27 = smov 0   ;;  %s1538_s28 = smov 0  }
   0x9 LB: > { %s1799_s5 = sld [smem:[#allocation13_spill]]  ;;  %s1556_s15 = sadd.s32 4294967295, %s1445_s28   ;;  %s1445_s28 = sphi %s1538_s28, %s1809_s28   ;;  %s1441_s27 = sphi %s1536_s27, %s1808_s27   ;;  %s1437_s26 = sphi %s1534_s26, %s1807_s26   ;;  %s1433_s25 = sphi %s1532_s25, %s1806_s25  }
   0xa   : > { %p1107_p0 = scmp.ge.s32.totalorder %s1445_s28, 1  ;;  %p75_p1 = scmp.eq.s32.totalorder %s1556_s15, 0 }
   0xb   : > { %p357_p2 = scmp.lt.s32.totalorder %s1445_s28, 3  ;;  %s1447_s17 = smov [#allocation4]  }
   0xc   : > { %s374_s18 = sshll.u32 %s1447_s17, 4  ;;  %s1801_s9 = sld [smem:[#allocation15_spill]]  ;;  %s375_s18 = int_to_ptr.vmem [resolvable:$true] %s374_s18 }
   0xd   : > { %p1561_p3 = pnand %p1107_p0, %p357_p2  ;;  %s1448_s23 = smov [#allocation7]  }
   0xe   : > { %s404_s24 = sshll.u32 %s1448_s23, 4  ;;  %s1803_s7 = sld [smem:[#allocation14_spill]]  ;;  %s405_s24 = int_to_ptr.vmem [resolvable:$true] %s404_s24 }
   0xf   : > { %s372_s14 = sshll.u32 %s1799_s5, 4  ;;  %p1155_p4 = pneg %p1561_p3  ;;  %s373_s14 = int_to_ptr.hbm [resolvable:$true] %s372_s14 }
  0x10   : > { %s417_s23 = sshll.u32 %s1793_s11, 4  ;;  %s1449_s5 = smov [#allocation6]   ;;  %s418_s23 = int_to_ptr.hbm [resolvable:$true] %s417_s23 }
  0x11   : > { %p1572_p5 = pnand %p1155_p4, %p75_p1  ;;  %s389_s29 = sshll.u32 %s1449_s5, 4  ;;  %s390_s29 = int_to_ptr.vmem [resolvable:$true] %s389_s29 }
  0x12   : > { %s402_s21 = sshll.u32 %s1801_s9, 4  ;;  %s61_s30 = sadd.s32 1, %s1441_s27  ;;  %s403_s21 = int_to_ptr.hbm [resolvable:$true] %s402_s21 }
  0x13   : > { %1158 = dma.hbm_to_vmem [thread:$0]  (!%p1572_p5), %s373_s14, 16, %s375_s18, [#allocation5]  }
  0x14   : > { %s387_s17 = sshll.u32 %s1803_s7, 4  ;;  %s1450_s14 = smov [#allocation9]   ;;  %s388_s17 = int_to_ptr.hbm [resolvable:$true] %s387_s17 }
  0x15   : > { %1164 = dma.hbm_to_vmem [thread:$0]  (!%p1572_p5), %s403_s21, 16, %s405_s24, [#allocation8]  }
  0x16   : > { %1161 = dma.hbm_to_vmem [thread:$0]  (!%p1572_p5), %s388_s17, 16, %s390_s29, [#allocation5]  }
  0x17   : > { %s419_s18 = sshll.u32 %s1450_s14, 4  ;;  %s1591_s21 = sadd.s32 1, %s1445_s28   ;;  %s420_s18 = int_to_ptr.vmem [resolvable:$true] %s419_s18 }
  0x18   : > { %1167 = dma.hbm_to_vmem [thread:$0]  (!%p1572_p5), %s418_s23, 16, %s420_s18, [#allocation8]  }
  0x19   : > { %s58_s24 = ssub.s32 %s1445_s28, %s1591_s21  ;;  %p68_p7 = scmp.ne.s32.totalorder %s1441_s27, %s1437_s26 }
  0x1a   : > { %p59_p6 = scmp.eq.s32.totalorder %s58_s24, 0  ;;  %p69_p8 = scmp.eq.s32.totalorder %s1445_s28, 0 }
  0x1b   : > { %p74_p9 = scmp.ne.s32.totalorder %s1437_s26, %s1433_s25  ;;  %p1176_p11 = scmp.lt.s32.totalorder %s1445_s28, 2 }
  0x1c   : > { %s1602_s5 = scalar_select %p59_p6, %s1441_s27, %s61_s30  }
  0x1d   : > { %p1606_p10 = por %p75_p1, %p74_p9  ;;  %s437_s19 = sand.u32 1, %s1441_s27  }
  0x1e   : > { %s1114_s22 = sshll.u32 %s1445_s28, 3  ;;  %p70_p12 = por %p69_p8, %p68_p7 }
  0x1f   : > { %s1113_s20 = sshll.u32 %s437_s19, 3  ;;  %s445_s14 = scalar_lea.hbm %s1783_s1, %s1114_s22 }
  0x20   : > { %s447_s18 = sshll.u32 %s445_s14, 4  ;;  %s441_s24 = scalar_lea.vmem [#allocation2], %s1113_s20  ;;  %s448_s18 = int_to_ptr.hbm [resolvable:$true] %s447_s18 }
  0x21   : > { %s449_s7 = sshll.u32 %s441_s24, 4  ;;  %p1616_p13 = pnand %p1176_p11, %p70_p12  ;;  %s450_s7 = int_to_ptr.vmem [resolvable:$true] %s449_s7 }
  0x22   : > { %s438_s30 = scalar_lea.sflag [#allocation3], %s437_s19  ;;  %s1373_s9 = sshra.s32 %s448_s18, 4  ;;  %s1374_s9 = int_to_ptr.hbm [resolvable:$true] %s1373_s9 }
  0x23   : > { %s1375_s28 = scalar_lea.hbm %s1374_s9, 8  ;;  %p1377_p2 = pneg %p1616_p13 }
  0x24   : > { %p1376_p0 = scmp.ne.s32.totalorder %s1374_s9, %s1375_s28  ;;  %s1380_s20 = scalar_lea.hbm %s1783_s1, 16 }
  0x25   : > { %p1381_p6 = scmp.lt.s32.totalorder %s1374_s9, %s1783_s1  ;;  %p1382_p7 = scmp.lt.s32.totalorder %s1380_s20, %s1375_s28 }
  0x26   : > { %p1378_p4 = pnand %p1377_p2, %p1376_p0 }
  0x27   : > { %p1383_p8 = por %p1382_p7, %p1381_p6 }
  0x28   : > { %p1379_p5 = pneg %p1378_p4 }
  0x2a   : > { %p1384_p9 = pnand %p1383_p8, %p1379_p5 }
  0x2c   : > { %1387 = shalt.err (!%p1384_p9)
}
  0x2d   : > { %1171 = dma.hbm_to_vmem [thread:$0]  (!%p1616_p13), %s448_s18, 128, %s450_s7, %s438_s30  }
  0x2e   : > { %477 = sbr.rel (%p1561_p3) target bundleno = 1673 (0x689), region = 72  ;;  %s479_s19 = sand.u32 (!%p1561_p3), 1, %s1437_s26  }
  0x2f   : > { %s1633_s24 = sshll.u32 (!%p1561_p3), %s479_s19, 3  ;;  %s480_s22 = scalar_lea.sflag (!%p1561_p3), [#allocation3], %s479_s19 }
  0x30   : > { %s483_s23 = scalar_lea.vmem (!%p1561_p3), [#allocation2], %s1633_s24 }
  0x33   : > { %1420 = dma.done.wait (%p1606_p10), %s480_s22, 128  }
  0x34   : > { %1422 = vsyncadd (%p1606_p10), %s480_s22, 4294967168 }
  0x35   : > { %1424 = dma.done.wait (%p75_p1), [#allocation5], 32  }
  0x36   : > { %1426 = vsyncadd (%p75_p1), [#allocation5], 4294967264 }
  0x37   : > { %1428 = dma.done.wait (%p75_p1), [#allocation8], 32  }
  0x38   : > { %1430 = vsyncadd (%p75_p1), [#allocation8], 4294967264  ;;  %p560_p3 = scmp.lt.s32.totalorder %s1556_s15, 1  ;;  %vm585_vm0 = vcmask 261120   ;;  %v1451_v2 = vmov 32.0   ;;  %v657_v14 = vld [vmem:[%s1790_s8 + $0x10] sm:$0xff] }
  0x39   : > { %1231 = vrcp.f32 %v1451_v2  ;;  %v658_v15 = vld [vmem:[%s1790_s8 + $0x18] sm:$0xff]  ;;  %v655_v17 = vld [vmem:[%s1790_s8] sm:$0xff]  ;;  %v656_v18 = vld [vmem:[%s1790_s8 + $0x8] sm:$0xff]  ;;  %s1453_s16 = smov 120   ;;  %vm686_vm4 = vcmask 64512   ;;  %s1455_s18 = smov 112  }
  0x3a   : > { %s1811_s15 = smov (!%p560_p3, %s1556_s15), 1  ;;  %v661_v16 = vpack.c.bf16 %v658_v15, %v657_v14  ;;  %v580_v19 = vld [vmem:[%s483_s23] sm:$0xff]  ;;  %v660_v20 = vpack.c.bf16 %v656_v18, %v655_v17  ;;  %v630_v21 = vld [vmem:[%s1788_s6 + $0x10] sm:$0xff]  ;;  %v631_v22 = vld [vmem:[%s1788_s6 + $0x18] sm:$0xff]  ;;  %vm726_vm5 = vcmask 1043456   ;;  %s1456_s24 = smov 88  }
  0x3b   : > { %s1653_s7 = sshll.u32 %s1811_s15, 3  ;;  %v628_v23 = vld [vmem:[%s1788_s6] sm:$0xff]  ;;  %v634_v24 = vpack.c.bf16 %v631_v22, %v630_v21  ;;  %v629_v25 = vld [vmem:[%s1788_s6 + $0x8] sm:$0xff]  ;;  %v659_v26 = vpack.c.bf16 %v580_v19, %v580_v19  ;;  %s566_s20 = scalar_lea.vmem %s1784_s2, %s1811_s15  ;;  %v584_v44 = vld [vmem:[#allocation4] sm:$0x1]  ;;  %vm928_vm7 = vcmask 130048  }
  0x3c   : > { %s563_s17 = scalar_lea.vmem %s1782_s0, %s1653_s7  ;;  %675 = vmatpush.bf16.msra.mxu1 %v661_v16  ;;  %v633_v27 = vpack.c.bf16 %v629_v25, %v628_v23  ;;  %v581_v36 = vld [vmem:[%s566_s20] sm:$0x1]  ;;  %s569_s9 = scalar_lea.vmem %s1785_s3, %s1811_s15  ;;  %v1228_v54 = vld [vmem:[#allocation7] ss:$0 sm:$0xff]  ;;  %v1229_v60 = vld [vmem:[#allocation6] ss:$0 sm:$0xff] }
  0x3d   : > { %v1659_v0 = vld [vmem:[%s563_s17] sm:$0xff]  ;;  %648 = vmatpush.bf16.msra.mxu0 %v634_v24  ;;  %s1452_s15 = smov 96   ;;  %s1454_s17 = smov 104   ;;  %vm930_vm8 = vcmask 195584  }
  0x3e   : > { %v586_v1 = vsel %vm585_vm0, %v1659_v0, 0.0  ;;  %v583_v37 = vld [vmem:[%s1786_s4] sm:$0x1]  ;;  %s573_s28 = scalar_lea.vmem %s1794_s12, %s1653_s7  ;;  %s1457_s23 = smov 80  }
  0x3f   : > { %587 = vadd.xlane.f32.xlu0 %v586_v1  ;;  %v1232_v3 = vpop.eup %1231  ;;  %v617_v41 = vadd.f32 %v583_v37, %v581_v36  ;;  %v582_v43 = vld [vmem:[%s569_s9] sm:$0x1]  ;;  %s1458_s20 = smov 72   ;;  %s1459_s29 = smov 8  }
  0x40   : > { %v590_v4 = vmul.f32 32.0, %v1232_v3  ;;  %vm594_vm1 = vweird.f32 %v1232_v3  ;;  %676 = vmatpush.bf16.msra.mxu1 %v660_v20  ;;  %v623_v47 = vadd.f32 %v584_v44, %v582_v43  ;;  %s1460_s14 = smov 16   ;;  %s1461_s19 = smov 24  }
  0x41   : > { %649 = vmatpush.bf16.msra.mxu0 %v633_v27  ;;  %v619_v46 = vperm.slane %v617_v41, 0 }
  0x42   : > { %v591_v5 = vsub.f32 1.0, %v590_v4  ;;  %v625_v49 = vperm.slane %v623_v47, 0 }
  0x43   : > { %1125 = vmatmul.msk.bf16.vlgmr.msra.gmra.mxu1 %vm585_vm0, %v659_v26 }
  0x44   : > { %v592_v6 = vmul.f32 %v1232_v3, %v591_v5 }
  0x46   : > { %v593_v7 = vadd.f32 %v1232_v3, %v592_v6 }
  0x48   : > { %v595_v8 = vsel %vm594_vm1, %v1232_v3, %v593_v7  ;;  %v682_v7 = vld [vmem:[%s573_s28] sm:$0xff] }
  0x49   : > { %vm706_vm6 = vcmp.eq.f32.partialorder %v682_v7, 0.0 }
  0xb2   : > { %v588_v9 = vpop.xlane.xlu0 %587 }
  0xb3   : > { %v596_v10 = vmul.f32 %v595_v8, %v588_v9 }
  0xb5   : > { %v597_v11 = vsub.f32 %v1659_v0, %v596_v10 }
  0xb7   : > { %v598_v12 = vmul.f32 %v597_v11, %v597_v11  ;;  %v621_v48 = vmul.f32 %v619_v46, %v597_v11 }
  0xb9   : > { %v599_v13 = vsel %vm585_vm0, %v598_v12, 0.0 }
  0xba   : > { %600 = vadd.xlane.f32.xlu0 %v599_v13 }
  0xc0   : > { %v678_v55 = vpop.f32.mrf.mxu1 }
  0xc1   : > { %v679_v56 = vadd.f32 %v1228_v54, %v678_v55 }
  0xc3   : > { %v1704_v57 = vpack.c.bf16 %v679_v56, %v679_v56 }
  0xc5   : > { %721 = vrot.lane.b32.xlu2 %v1704_v57, %s1452_s15  ;;  %v691_v59 = vsel %vm686_vm4, %v1704_v57, 0 }
  0xc6   : > { %700 = vmatpush.bf16.xpose.msra.mxu2 %v691_v59 }
  0xc8   : > { %v680_v58 = vpop.f32.mrf.mxu1 }
  0xcd   : > { %746 = vrot.lane.b32.xlu2 %v1704_v57, %s1453_s16 }
  0xd5   : > { %860 = vrot.lane.b32.xlu2 %v1704_v57, %s1454_s17 }
 0x11f   : > { %v722_v3 = vpop.permute.xlu2 %721 }
 0x120   : > { %v728_v4 = vsel %vm726_vm5, %v722_v3, 0 }
 0x121   : > { %737 = vmatpush.bf16.msra.mxu3 %v728_v4 }
 0x127   : > { %v747_v5 = vpop.permute.xlu2 %746 }
 0x128   : > { %v752_v6 = vsel %vm686_vm4, %v747_v5, 0 }
 0x129   : > { %761 = vmatpush.bf16.xpose.msrb.mxu3 %v752_v6 }
 0x12d   : > { %v601_v28 = vpop.xlane.xlu0 %600 }
 0x12e   : > { %v602_v29 = vmul.f32 0.032258064, %v601_v28 }
 0x12f   : > { %v861_v20 = vpop.permute.xlu2 %860 }
 0x130   : > { %1233 = vrsqrt.f32 %v602_v29  ;;  %vm610_vm2 = vcmp.eq.f32.partialorder %v602_v29, inf  ;;  %v613_v39 = vand.u32 2147483648, %v602_v29  ;;  %vm612_vm3 = vcmp.eq.f32.partialorder %v602_v29, 0.0 }
 0x131   : > { %v866_v22 = vsel %vm686_vm4, %v861_v20, 0 }
 0x136   : > { %v1234_v30 = vpop.eup %1233 }
 0x137   : > { %v604_v31 = vmul.f32 %v1234_v30, %v602_v29 }
 0x139   : > { %v605_v32 = vmul.f32 %v1234_v30, %v604_v31 }
 0x13b   : > { %v606_v33 = vmul.f32 0.5, %v605_v32 }
 0x13d   : > { %v607_v34 = vsub.f32 1.5, %v606_v33 }
 0x13f   : > { %v608_v35 = vmul.f32 %v1234_v30, %v607_v34 }
 0x141   : > { %v609_v38 = vmul.f32 %v608_v35, %v602_v29 }
 0x143   : > { %v611_v40 = vsel %vm610_vm2, %v602_v29, %v609_v38 }
 0x144   : > { %v614_v42 = vsel %vm612_vm3, %v613_v39, %v611_v40 }
 0x145   : > { %v615_v45 = vadd.f32 1e-06, %v614_v42 }
 0x147   : > { %1235 = vrcp.f32 %v615_v45 }
 0x14d   : > { %v1236_v50 = vpop.eup %1235 }
 0x14e   : > { %v622_v51 = vmul.f32 %v1236_v50, %v621_v48 }
 0x150   : > { %v627_v52 = vadd.f32 %v625_v49, %v622_v51 }
 0x152   : > { %v632_v53 = vpack.c.bf16 %v627_v52, %v627_v52 }
 0x154   : > { %1124 = vmatmul.msk.bf16.vlgmr.msra.gmra.mxu0 %vm585_vm0, %v632_v53 }
 0x1d1   : > { %v651_v61 = vpop.f32.mrf.mxu0 }
 0x1d2   : > { %v652_v62 = vadd.f32 %v1229_v60, %v651_v61 }
 0x1d4   : > { %v683_v63 = vmul.f32 0.35355338, %v652_v62 }
 0x1d6   : > { %v684_v1 = vpack.c.bf16 %v683_v63, %v683_v63 }
 0x1d8   : > { %801 = vrot.lane.b32.xlu2 %v684_v1, %s1455_s18  ;;  %744 = vrot.lane.b32.xlu0 %v684_v1, %s1453_s16 }
 0x1d9   : > { %1126 = vmatmul.msk.bf16.vlgmr.msra.gmra.mxu2 %vm686_vm4, %v684_v1  ;;  %v653_v2 = vpop.f32.mrf.mxu0 }
 0x1e0   : > { %858 = vrot.lane.b32.xlu2 %v684_v1, %s1454_s17 }
 0x232   : > { %v802_v26 = vpop.permute.xlu2 %801 }
 0x23a   : > { %v859_v27 = vpop.permute.xlu2 %858 }
 0x24a   : > { %v745_v25 = vpop.permute.xlu0 %744 }
 0x25c   : > { %v702_v8 = vpop.f32.mrf.mxu2 }
 0x25d   : > { %v707_v9 = vsel %vm706_vm6, -1e+09, %v702_v8 }
 0x25e   : > { %v708_v10 = vsel %vm686_vm4, %v707_v9, -inf }
 0x25f   : > { %709 = vmax.xlane.f32.xlu1 %v708_v10 }
 0x264   : > { %v704_v11 = vpop.f32.mrf.mxu2 }
 0x2d2   : > { %v710_v12 = vpop.xlane.xlu1 %709 }
 0x2d3   : > { %v711_v13 = vsub.f32 %v707_v9, %v710_v12 }
 0x2d5   : > { %v712_v14 = vmul.f32 1.442695, %v711_v13 }
 0x2d7   : > { %1237 = vpow2.f32 %v712_v14 }
 0x2dd   : > { %v1238_v15 = vpop.eup %1237 }
 0x2de   : > { %v714_v16 = vsel %vm686_vm4, %v1238_v15, 0.0 }
 0x2df   : > { %715 = vadd.xlane.f32.xlu1 %v714_v16 }
 0x2f8   : > { %803 = vrot.lane.b32.xlu1 %v1704_v57, %s1455_s18 }
 0x352   : > { %v716_v17 = vpop.xlane.xlu1 %715 }
 0x353   : > { %1239 = vrcp.f32 %v716_v17 }
 0x359   : > { %v1240_v18 = vpop.eup %1239 }
 0x35a   : > { %v718_v19 = vmul.f32 %v1240_v18, %v1238_v15  ;;  %v934_v18 = vld [vmem:[%s1792_s10 + $0x10] sm:$0xff] }
 0x35c   : > { %v719_v21 = vpack.c.bf16 %v718_v19, %v718_v19  ;;  %v935_v19 = vld [vmem:[%s1792_s10 + $0x18] sm:$0xff] }
 0x35d   : > { %v938_v20 = vpack.c.bf16 %v935_v19, %v934_v18 }
 0x35e   : > { %1127 = vmatmul.msk.bf16.vlgmr.msra.gmra.mxu3 %vm686_vm4, %v719_v21  ;;  %v932_v21 = vld [vmem:[%s1792_s10] sm:$0xff] }
 0x35f   : > { %875 = vmatpush.bf16.xpose.msra.mxu3 %v866_v22  ;;  %v933_v22 = vld [vmem:[%s1792_s10 + $0x8] sm:$0xff] }
 0x36a   : > { %v804_v23 = vpop.permute.xlu1 %803 }
 0x36b   : > { %v809_v24 = vsel %vm686_vm4, %v804_v23, 0  ;;  %v937_v23 = vpack.c.bf16 %v933_v22, %v932_v21 }
 0x36c   : > { %818 = vmatpush.bf16.xpose.msrb.mxu1 %v809_v24 }
 0x36e   : > { %1128 = vmatmul.msk.bf16.vlgmr.msrb.gmra.mxu3 %vm686_vm4, %v745_v25 }
 0x373   : > { %1130 = vmatmul.msk.bf16.vlgmr.msrb.gmra.mxu1 %vm686_vm4, %v802_v26 }
 0x374   : > { %952 = vmatpush.bf16.msra.mxu1 %v938_v20 }
 0x378   : > { %953 = vmatpush.bf16.msra.mxu1 %v937_v23 }
 0x37e   : > { %1132 = vmatmul.msk.bf16.vlgmr.msra.gmra.mxu3 %vm686_vm4, %v859_v27 }
 0x3e1   : > { %v1728_v28 = vpop.f32.mrf.mxu3 }
 0x3e9   : > { %v741_v29 = vpop.f32.mrf.mxu3 }
 0x3f0   : > { %v820_v30 = vpop.f32.mrf.mxu1 }
 0x3f1   : > { %v824_v31 = vsel %vm706_vm6, -1e+09, %v820_v30  ;;  %v763_v32 = vpop.f32.mrf.mxu3 }
 0x3f2   : > { %v767_v33 = vsel %vm706_vm6, -1e+09, %v763_v32  ;;  %v825_v34 = vsel %vm686_vm4, %v824_v31, -inf  ;;  %v1230_v32 = vld [vmem:[#allocation9] ss:$0 sm:$0xff] }
 0x3f3   : > { %826 = vmax.xlane.f32.xlu2 %v825_v34  ;;  %v768_v35 = vsel %vm686_vm4, %v767_v33, -inf }
 0x3f4   : > { %769 = vmax.xlane.f32.xlu0 %v768_v35 }
 0x3f8   : > { %v822_v36 = vpop.f32.mrf.mxu1 }
 0x3f9   : > { %v765_v37 = vpop.f32.mrf.mxu3 }
 0x401   : > { %v877_v38 = vpop.f32.mrf.mxu3 }
 0x402   : > { %v881_v39 = vsel %vm706_vm6, -1e+09, %v877_v38 }
 0x403   : > { %v882_v40 = vsel %vm686_vm4, %v881_v39, -inf }
 0x404   : > { %883 = vmax.xlane.f32.xlu1 %v882_v40 }
 0x409   : > { %v879_v41 = vpop.f32.mrf.mxu3 }
 0x40b   : > { %780 = vrot.lane.b32.xlu2 %v1704_v57, %s1456_s24 }
 0x466   : > { %v827_v42 = vpop.xlane.xlu2 %826 }
 0x467   : > { %v828_v43 = vsub.f32 %v824_v31, %v827_v42  ;;  %v770_v44 = vpop.xlane.xlu0 %769 }
 0x468   : > { %v771_v45 = vsub.f32 %v767_v33, %v770_v44 }
 0x469   : > { %v829_v46 = vmul.f32 1.442695, %v828_v43 }
 0x46a   : > { %v772_v47 = vmul.f32 1.442695, %v771_v45 }
 0x46b   : > { %1241 = vpow2.f32 %v829_v46 }
 0x46c   : > { %1243 = vpow2.f32 %v772_v47 }
 0x46e   : > { %v781_v48 = vpop.permute.xlu2 %780 }
 0x46f   : > { %v786_v49 = vsel %vm726_vm5, %v781_v48, 0 }
 0x470   : > { %795 = vmatpush.bf16.msrb.mxu0 %v786_v49 }
 0x471   : > { %v1242_v50 = vpop.eup %1241 }
 0x472   : > { %v1244_v51 = vpop.eup %1243  ;;  %v831_v52 = vsel %vm686_vm4, %v1242_v50, 0.0 }
 0x473   : > { %832 = vadd.xlane.f32.xlu1 %v831_v52  ;;  %v774_v53 = vsel %vm686_vm4, %v1244_v51, 0.0 }
 0x474   : > { %775 = vadd.xlane.f32.xlu0 %v774_v53 }
 0x477   : > { %v884_v54 = vpop.xlane.xlu1 %883 }
 0x478   : > { %v885_v55 = vsub.f32 %v881_v39, %v884_v54 }
 0x47a   : > { %v886_v56 = vmul.f32 1.442695, %v885_v55 }
 0x47c   : > { %1245 = vpow2.f32 %v886_v56 }
 0x482   : > { %v1246_v58 = vpop.eup %1245 }
 0x483   : > { %v888_v59 = vsel %vm686_vm4, %v1246_v58, 0.0 }
 0x484   : > { %889 = vadd.xlane.f32.xlu0 %v888_v59 }
 0x48c   : > { %837 = vrot.lane.b32.xlu1 %v1704_v57, %s1457_s23  ;;  %s577_s23 = scalar_lea.vmem %s1795_s13, %s1653_s7 }
 0x498   : > { %894 = vrot.lane.b32.xlu0 %v1704_v57, %s1458_s20 }
 0x4e6   : > { %v833_v63 = vpop.xlane.xlu1 %832 }
 0x4e7   : > { %v776_v60 = vpop.xlane.xlu0 %775 }
 0x4e8   : > { %1247 = vrcp.f32 %v776_v60 }
 0x4e9   : > { %1249 = vrcp.f32 %v833_v63 }
 0x4ee   : > { %v1248_v61 = vpop.eup %1247 }
 0x4ef   : > { %v778_v62 = vmul.f32 %v1248_v61, %v1244_v51  ;;  %v1250_v2 = vpop.eup %1249 }
 0x4f0   : > { %v835_v3 = vmul.f32 %v1250_v2, %v1242_v50 }
 0x4f1   : > { %v779_v1 = vpack.c.bf16 %v778_v62, %v778_v62 }
 0x4f2   : > { %v836_v7 = vpack.c.bf16 %v835_v3, %v835_v3 }
 0x4f3   : > { %1129 = vmatmul.msk.bf16.vlgmr.msrb.gmra.mxu0 %vm686_vm4, %v779_v1 }
 0x4f7   : > { %v890_v4 = vpop.xlane.xlu0 %889 }
 0x4f8   : > { %1251 = vrcp.f32 %v890_v4 }
 0x4fe   : > { %v838_v5 = vpop.permute.xlu1 %837  ;;  %v1252_v57 = vpop.eup %1251 }
 0x4ff   : > { %v843_v6 = vsel %vm726_vm5, %v838_v5, 0  ;;  %v892_v8 = vmul.f32 %v1252_v57, %v1246_v58 }
 0x500   : > { %852 = vmatpush.bf16.msrb.mxu2 %v843_v6 }
 0x501   : > { %v893_v11 = vpack.c.bf16 %v892_v8, %v892_v8 }
 0x503   : > { %1131 = vmatmul.msk.bf16.vlgmr.msrb.gmra.mxu2 %vm686_vm4, %v836_v7 }
 0x50a   : > { %v895_v9 = vpop.permute.xlu0 %894 }
 0x50b   : > { %v900_v10 = vsel %vm726_vm5, %v895_v9, 0 }
 0x50c   : > { %909 = vmatpush.bf16.msra.mxu0 %v900_v10 }
 0x50f   : > { %1133 = vmatmul.msk.bf16.vlgmr.msra.gmra.mxu0 %vm686_vm4, %v893_v11 }
 0x570   : > { %v797_v12 = vpop.f32.mrf.mxu0 }
 0x571   : > { %916 = vrot.lane.b32.xlu2 %v797_v12, %s1459_s29 }
 0x578   : > { %v799_v13 = vpop.f32.mrf.mxu0 }
 0x586   : > { %v854_v14 = vpop.f32.mrf.mxu2 }
 0x587   : > { %920 = vrot.lane.b32.xlu2 %v854_v14, %s1460_s14 }
 0x58c   : > { %v911_v15 = vpop.f32.mrf.mxu0 }
 0x58d   : > { %924 = vrot.lane.b32.xlu0 %v911_v15, %s1461_s19 }
 0x58e   : > { %v856_v16 = vpop.f32.mrf.mxu2 }
 0x594   : > { %v913_v17 = vpop.f32.mrf.mxu0 }
 0x5cb   : > { %v917_v24 = vpop.permute.xlu2 %916 }
 0x5cc   : > { %v927_v26 = vsel %vm686_vm4, %v1728_v28, %v917_v24 }
 0x5e1   : > { %v921_v25 = vpop.permute.xlu2 %920 }
 0x5e2   : > { %v929_v27 = vsel %vm928_vm7, %v927_v26, %v921_v25 }
 0x5ff   : > { %v925_v29 = vpop.permute.xlu0 %924 }
 0x600   : > { %v931_v30 = vsel %vm930_vm8, %v929_v27, %v925_v29 }
 0x601   : > { %v936_v31 = vpack.c.bf16 %v931_v30, %v931_v30 }
 0x603   : > { %1134 = vmatmul.msk.bf16.vlgmr.msra.gmra.mxu1 %vm585_vm0, %v936_v31 }
 0x680   : > { %v955_v33 = vpop.f32.mrf.mxu1 }
 0x681   : > { %v956_v34 = vadd.f32 %v1230_v32, %v955_v33 }
 0x683   : > { %v959_v35 = vadd.f32 %v956_v34, %v1659_v0 }
 0x685   : > { %960 = vst.msk [vmem:[%s577_s23] sm:$0xff] %vm585_vm0, %v959_v35 }
 0x688   : > { %v957_v36 = vpop.f32.mrf.mxu1 }
 0x689 PF: > { %p25_p1 = scmp.ge.s32.totalorder %s1591_s21, 4   ;;  %s1806_s25 = smov %s1437_s26 }
 0x68a   : > { %s1807_s26 = smov %s1441_s27  ;;  %s1808_s27 = smov %s1602_s5 }
 0x68b   : > { %s1809_s28 = smov %s1591_s21  ;;  %27 = sbr.rel (!%p25_p1) target bundleno = 9 (0x9), region = 140 }
 0x690   :  { %980 = vsyncpa [#allocation3], 1 }
 0x691   :  { %982 = vsyncpa [#allocation3 + $0x1], 1 }
 0x692   :  { %983 = vsyncpa [#allocation5], 1 }
 0x693   :  { %984 = vsyncpa [#allocation8], 1 }

// kernel: decoder_layer.5
= control target key start
LH: loop header
LB: loop body
LE: loop exit
PB: predicated region body
PF: predicated region fallthrough
CT: control target
= control target key end

     0   :  { %15 = vsyncpa [#allocation3], 0  ;;  %s1266_s0 = inlined_call_operand.vmem [shape: f32[2,8,32], index: 0, kind: input, shape index: {}]   ;;  %s1267_s1 = inlined_call_operand.vmem [shape: f32[2,1,32], index: 1, kind: input, shape index: {}]   ;;  %s1268_s2 = inlined_call_operand.vmem [shape: f32[2,1,32], index: 2, kind: input, shape index: {}]   ;;  %s1269_s3 = inlined_call_operand.vmem [shape: f32[1,32], index: 3, kind: input, shape index: {}]   ;;  %s1270_s4 = inlined_call_operand.hbm [shape: f32[1,32], index: 4, kind: input, shape index: {}]   ;;  %s1271_s5 = inlined_call_operand.vmem [shape: f32[32,96], index: 5, kind: input, shape index: {}]   ;;  %s1272_s6 = inlined_call_operand.hbm [shape: f32[1,96], index: 6, kind: input, shape index: {}]   ;;  %s1273_s7 = inlined_call_operand.vmem [shape: f32[32,32], index: 7, kind: input, shape index: {}]   ;;  %s1274_s8 = inlined_call_operand.vmem [shape: f32[1,32], index: 8, kind: input, shape index: {}]   ;;  %s1275_s9 = inlined_call_operand.vmem [shape: f32[2,8,8], index: 9, kind: input, shape index: {}]   ;;  %s1276_s10 = inlined_call_operand.vmem [shape: f32[2,8,32], index: 10, kind: output, shape index: {}]  }
   0x1   :  { %16 = vsyncpa [#allocation5], 0  ;;  %s1132_s13 = smov 0  }
   0x2 LB: > { %s298_s16 = sshll.u32 %s1270_s4, 4  ;;  %s892_s17 = sadd.s32 4294967295, %s1058_s13   ;;  %s1058_s13 = sphi %s1132_s13, %s22_s13   ;;  %s299_s16 = int_to_ptr.hbm [resolvable:$true] %s298_s16 }
   0x3   : > { %p894_p0 = scmp.ge.s32.totalorder %s1058_s13, 1  ;;  %p283_p1 = scmp.lt.s32.totalorder %s1058_s13, 3 }
   0x4   : > { %p931_p2 = scmp.eq.s32.totalorder %s892_s17, 0  ;;  %s1060_s19 = smov [#allocation2]  }
   0x5   : > { %p1143_p3 = pnand %p894_p0, %p283_p1  ;;  %s300_s20 = sshll.u32 %s1060_s19, 4  ;;  %s301_s20 = int_to_ptr.vmem [resolvable:$true] %s300_s20 }
   0x6   : > { %s313_s23 = sshll.u32 %s1272_s6, 4  ;;  %s1061_s24 = smov [#allocation4]   ;;  %s314_s23 = int_to_ptr.hbm [resolvable:$true] %s313_s23 }
   0x7   : > { %p924_p4 = pneg %p1143_p3  ;;  %s315_s25 = sshll.u32 %s1061_s24, 4  ;;  %s316_s25 = int_to_ptr.vmem [resolvable:$true] %s315_s25 }
   0x8   : > { %360 = sbr.rel (%p1143_p3) target bundleno = 1352 (0x548), region = 60 }
   0x9   : > { %p925_p5 = pnand %p931_p2, %p924_p4 }
   0xb   : > { %927 = dma.hbm_to_vmem [thread:$0]  (!%p925_p5), %s299_s16, 16, %s301_s20, [#allocation3]  }
   0xc   : > { %930 = dma.hbm_to_vmem [thread:$0]  (!%p925_p5), %s314_s23, 16, %s316_s25, [#allocation5]  }
   0xd   : > { %1049 = dma.done.wait (%p931_p2), [#allocation3], 16  }
   0xe   : > { %1051 = vsyncadd (%p931_p2), [#allocation3], 4294967280 }
   0xf   : > { %1053 = dma.done.wait (%p931_p2), [#allocation5], 16  }
  0x10   : > { %1055 = vsyncadd (%p931_p2), [#allocation5], 4294967280  ;;  %p412_p6 = scmp.lt.s32.totalorder %s892_s17, 1  ;;  %vm436_vm0 = vcmask 261120   ;;  %v1062_v2 = vmov 32.0   ;;  %v481_v14 = vld [vmem:[%s1271_s5 + $0x10] sm:$0xff] }
  0x11   : > { %962 = vrcp.f32 %v1062_v2  ;;  %v482_v15 = vld [vmem:[%s1271_s5 + $0x18] sm:$0xff]  ;;  %v479_v16 = vld [vmem:[%s1271_s5] sm:$0xff]  ;;  %v480_v18 = vld [vmem:[%s1271_s5 + $0x8] sm:$0xff]  ;;  %s1065_s30 = smov 120   ;;  %s1066_s11 = smov 88   ;;  %vm513_vm4 = vcmask 64512  }
  0x12   : > { %s1279_s17 = smov (!%p412_p6, %s892_s17), 1  ;;  %v485_v17 = vpack.c.bf16 %v482_v15, %v481_v14  ;;  %v484_v19 = vpack.c.bf16 %v480_v18, %v479_v16  ;;  %v434_v29 = vld [vmem:[%s1269_s3] sm:$0x1]  ;;  %v960_v46 = vld [vmem:[#allocation4] ss:$0 sm:$0xff]  ;;  %s1067_s12 = smov 72  }
  0x13   : > { %s1162_s26 = sshll.u32 %s1279_s17, 3  ;;  %s418_s22 = scalar_lea.vmem %s1267_s1, %s1279_s17  ;;  %v435_v36 = vld [vmem:[#allocation2] sm:$0x1]  ;;  %vm552_vm6 = vcmask 1043456   ;;  %vm754_vm7 = vcmask 130048   ;;  %vm756_vm8 = vcmask 195584  }
  0x14   : > { %s415_s29 = scalar_lea.vmem %s1266_s0, %s1162_s26  ;;  %499 = vmatpush.bf16.msra.mxu0 %v485_v17  ;;  %v432_v28 = vld [vmem:[%s418_s22] sm:$0x1]  ;;  %s421_s28 = scalar_lea.vmem %s1268_s2, %s1279_s17 }
  0x15   : > { %v1168_v0 = vld [vmem:[%s415_s29] sm:$0xff]  ;;  %v468_v33 = vadd.f32 %v434_v29, %v432_v28  ;;  %s1063_s17 = smov 96   ;;  %s1064_s29 = smov 104  }
  0x16   : > { %v437_v1 = vsel %vm436_vm0, %v1168_v0, 0.0  ;;  %v433_v35 = vld [vmem:[%s421_s28] sm:$0x1]  ;;  %s1068_s14 = smov 80   ;;  %s1069_s15 = smov 112  }
  0x17   : > { %438 = vadd.xlane.f32.xlu0 %v437_v1  ;;  %v963_v3 = vpop.eup %962  ;;  %v470_v38 = vperm.slane %v468_v33, 0  ;;  %v474_v39 = vadd.f32 %v435_v36, %v433_v35  ;;  %s425_s19 = scalar_lea.vmem %s1275_s9, %s1162_s26  ;;  %s1070_s20 = smov 64  }
  0x18   : > { %v441_v4 = vmul.f32 32.0, %v963_v3  ;;  %vm445_vm1 = vweird.f32 %v963_v3  ;;  %500 = vmatpush.bf16.msra.mxu0 %v484_v19  ;;  %v506_v1 = vld [vmem:[%s425_s19] sm:$0xff]  ;;  %s1071_s21 = smov 56   ;;  %s1072_s22 = smov 40  }
  0x19   : > { %v476_v41 = vperm.slane %v474_v39, 0  ;;  %vm533_vm5 = vcmp.eq.f32.partialorder %v506_v1, 0.0  ;;  %s1073_s23 = smov 48   ;;  %s1074_s24 = smov 8  }
  0x1a   : > { %v442_v5 = vsub.f32 1.0, %v441_v4  ;;  %s1075_s25 = smov 24   ;;  %s1076_s27 = smov 16  }
  0x1c   : > { %v443_v6 = vmul.f32 %v963_v3, %v442_v5 }
  0x1e   : > { %v444_v7 = vadd.f32 %v963_v3, %v443_v6 }
  0x20   : > { %v446_v8 = vsel %vm445_vm1, %v963_v3, %v444_v7 }
  0x8a   : > { %v439_v9 = vpop.xlane.xlu0 %438 }
  0x8b   : > { %v447_v10 = vmul.f32 %v446_v8, %v439_v9 }
  0x8d   : > { %v448_v11 = vsub.f32 %v1168_v0, %v447_v10 }
  0x8f   : > { %v449_v12 = vmul.f32 %v448_v11, %v448_v11  ;;  %v472_v40 = vmul.f32 %v470_v38, %v448_v11 }
  0x91   : > { %v450_v13 = vsel %vm436_vm0, %v449_v12, 0.0 }
  0x92   : > { %451 = vadd.xlane.f32.xlu0 %v450_v13 }
 0x105   : > { %v452_v20 = vpop.xlane.xlu0 %451 }
 0x106   : > { %v453_v21 = vmul.f32 0.032258064, %v452_v20 }
 0x108   : > { %964 = vrsqrt.f32 %v453_v21  ;;  %vm461_vm2 = vcmp.eq.f32.partialorder %v453_v21, inf  ;;  %v464_v31 = vand.u32 2147483648, %v453_v21  ;;  %vm463_vm3 = vcmp.eq.f32.partialorder %v453_v21, 0.0 }
 0x10e   : > { %v965_v22 = vpop.eup %964 }
 0x10f   : > { %v455_v23 = vmul.f32 %v965_v22, %v453_v21 }
 0x111   : > { %v456_v24 = vmul.f32 %v965_v22, %v455_v23 }
 0x113   : > { %v457_v25 = vmul.f32 0.5, %v456_v24 }
 0x115   : > { %v458_v26 = vsub.f32 1.5, %v457_v25 }
 0x117   : > { %v459_v27 = vmul.f32 %v965_v22, %v458_v26 }
 0x119   : > { %v460_v30 = vmul.f32 %v459_v27, %v453_v21 }
 0x11b   : > { %v462_v32 = vsel %vm461_vm2, %v453_v21, %v460_v30 }
 0x11c   : > { %v465_v34 = vsel %vm463_vm3, %v464_v31, %v462_v32 }
 0x11d   : > { %v466_v37 = vadd.f32 1e-06, %v465_v34 }
 0x11f   : > { %966 = vrcp.f32 %v466_v37 }
 0x125   : > { %v967_v42 = vpop.eup %966 }
 0x126   : > { %v473_v43 = vmul.f32 %v967_v42, %v472_v40 }
 0x128   : > { %v478_v44 = vadd.f32 %v476_v41, %v473_v43 }
 0x12a   : > { %v483_v45 = vpack.c.bf16 %v478_v44, %v478_v44 }
 0x12c   : > { %904 = vmatmul.msk.bf16.vlgmr.msra.gmra.mxu0 %vm436_vm0, %v483_v45 }
 0x1a9   : > { %v502_v47 = vpop.f32.mrf.mxu0 }
 0x1aa   : > { %v503_v48 = vadd.f32 %v960_v46, %v502_v47 }
 0x1ac   : > { %v507_v49 = vmul.f32 0.35355338, %v503_v48  ;;  %v1198_v50 = vpack.c.bf16 %v503_v48, %v503_v48 }
 0x1ae   : > { %v508_v51 = vpack.c.bf16 %v507_v49, %v507_v49  ;;  %511 = vrot.lane.b32.xlu1 %v1198_v50, %s1063_s17 }
 0x1b0   : > { %684 = vrot.lane.b32.xlu0 %v508_v51, %s1064_s29  ;;  %570 = vrot.lane.b32.xlu2 %v508_v51, %s1065_s30 }
 0x1b1   : > { %v504_v52 = vpop.f32.mrf.mxu0 }
 0x1b6   : > { %572 = vrot.lane.b32.xlu1 %v1198_v50, %s1066_s11 }
 0x1b8   : > { %686 = vrot.lane.b32.xlu2 %v1198_v50, %s1067_s12 }
 0x1be   : > { %629 = vrot.lane.b32.xlu1 %v1198_v50, %s1068_s14 }
 0x1c0   : > { %627 = vrot.lane.b32.xlu2 %v508_v51, %s1069_s15 }
 0x20a   : > { %v571_v53 = vpop.permute.xlu2 %570 }
 0x212   : > { %v687_v56 = vpop.permute.xlu2 %686 }
 0x213   : > { %v692_v59 = vsel %vm513_vm4, %v687_v56, 0 }
 0x21a   : > { %v628_v62 = vpop.permute.xlu2 %627 }
 0x220   : > { %v512_v54 = vpop.permute.xlu1 %511 }
 0x221   : > { %v518_v55 = vsel %vm513_vm4, %v512_v54, 0 }
 0x222   : > { %527 = vmatpush.bf16.xpose.msra.mxu1 %v518_v55  ;;  %v685_v63 = vpop.permute.xlu0 %684 }
 0x228   : > { %v573_v57 = vpop.permute.xlu1 %572 }
 0x229   : > { %905 = vmatmul.msk.bf16.vlgmr.msra.gmra.mxu1 %vm513_vm4, %v508_v51  ;;  %v578_v58 = vsel %vm513_vm4, %v573_v57, 0 }
 0x22a   : > { %587 = vmatpush.bf16.xpose.msra.mxu3 %v578_v58 }
 0x230   : > { %v630_v60 = vpop.permute.xlu1 %629 }
 0x231   : > { %907 = vmatmul.msk.bf16.vlgmr.msra.gmra.mxu3 %vm513_vm4, %v571_v53  ;;  %v635_v61 = vsel %vm513_vm4, %v630_v60, 0 }
 0x232   : > { %701 = vmatpush.bf16.xpose.msrb.mxu3 %v692_v59  ;;  %644 = vmatpush.bf16.xpose.msrb.mxu0 %v635_v61 }
 0x239   : > { %909 = vmatmul.msk.bf16.vlgmr.msrb.gmra.mxu0 %vm513_vm4, %v628_v62 }
 0x241   : > { %911 = vmatmul.msk.bf16.vlgmr.msrb.gmra.mxu3 %vm513_vm4, %v685_v63 }
 0x2a6   : > { %v529_v2 = vpop.f32.mrf.mxu1 }
 0x2a7   : > { %v534_v3 = vsel %vm533_vm5, -1e+09, %v529_v2 }
 0x2a8   : > { %v535_v4 = vsel %vm513_vm4, %v534_v3, -inf }
 0x2a9   : > { %536 = vmax.xlane.f32.xlu1 %v535_v4 }
 0x2ae   : > { %v531_v5 = vpop.f32.mrf.mxu1 }
 0x2b4   : > { %v589_v6 = vpop.f32.mrf.mxu3 }
 0x2b5   : > { %v593_v7 = vsel %vm533_vm5, -1e+09, %v589_v6 }
 0x2b6   : > { %v646_v8 = vpop.f32.mrf.mxu0  ;;  %v594_v9 = vsel %vm513_vm4, %v593_v7, -inf }
 0x2b7   : > { %595 = vmax.xlane.f32.xlu2 %v594_v9  ;;  %v650_v10 = vsel %vm533_vm5, -1e+09, %v646_v8  ;;  %v761_v8 = vld [vmem:[%s1273_s7 + $0x18] sm:$0xff]  ;;  %v758_v9 = vld [vmem:[%s1273_s7] sm:$0xff] }
 0x2b8   : > { %v651_v13 = vsel %vm513_vm4, %v650_v10, -inf }
 0x2bc   : > { %v591_v11 = vpop.f32.mrf.mxu3 }
 0x2bd   : > { %v759_v11 = vld [vmem:[%s1273_s7 + $0x8] sm:$0xff] }
 0x2be   : > { %v648_v12 = vpop.f32.mrf.mxu0 }
 0x2bf   : > { %652 = vmax.xlane.f32.xlu2 %v651_v13  ;;  %v763_v12 = vpack.c.bf16 %v759_v11, %v758_v9 }
 0x2c4   : > { %v703_v14 = vpop.f32.mrf.mxu3 }
 0x2c5   : > { %v707_v15 = vsel %vm533_vm5, -1e+09, %v703_v14 }
 0x2c6   : > { %v708_v16 = vsel %vm513_vm4, %v707_v15, -inf }
 0x2c7   : > { %709 = vmax.xlane.f32.xlu0 %v708_v16 }
 0x2cc   : > { %v705_v17 = vpop.f32.mrf.mxu3 }
 0x2d7   : > { %547 = vrot.lane.b32.xlu2 %v1198_v50, %s1070_s20 }
 0x2db   : > { %606 = vrot.lane.b32.xlu0 %v1198_v50, %s1071_s21  ;;  %s429_s21 = scalar_lea.vmem %s1276_s10, %s1162_s26 }
 0x2df   : > { %720 = vrot.lane.b32.xlu2 %v1198_v50, %s1072_s22 }
 0x2e3   : > { %663 = vrot.lane.b32.xlu0 %v1198_v50, %s1073_s23 }
 0x31c   : > { %v537_v18 = vpop.xlane.xlu1 %536 }
 0x31d   : > { %v538_v19 = vsub.f32 %v534_v3, %v537_v18 }
 0x31f   : > { %v539_v20 = vmul.f32 1.442695, %v538_v19 }
 0x321   : > { %968 = vpow2.f32 %v539_v20  ;;  %v961_v20 = vld [vmem:[%s1274_s8] ss:$0 sm:$0xff] }
 0x327   : > { %v969_v21 = vpop.eup %968 }
 0x328   : > { %v541_v22 = vsel %vm513_vm4, %v969_v21, 0.0 }
 0x329   : > { %542 = vadd.xlane.f32.xlu1 %v541_v22 }
 0x32a   : > { %v596_v23 = vpop.xlane.xlu2 %595 }
 0x32b   : > { %v597_v24 = vsub.f32 %v593_v7, %v596_v23  ;;  %v760_v7 = vld [vmem:[%s1273_s7 + $0x10] sm:$0xff] }
 0x32d   : > { %v598_v25 = vmul.f32 1.442695, %v597_v24 }
 0x32f   : > { %970 = vpow2.f32 %v598_v25 }
 0x332   : > { %v653_v26 = vpop.xlane.xlu2 %652 }
 0x333   : > { %v654_v33 = vsub.f32 %v650_v10, %v653_v26  ;;  %v764_v10 = vpack.c.bf16 %v761_v8, %v760_v7 }
 0x335   : > { %v971_v27 = vpop.eup %970  ;;  %v655_v35 = vmul.f32 1.442695, %v654_v33  ;;  %778 = vmatpush.bf16.msra.mxu0 %v764_v10 }
 0x336   : > { %v600_v28 = vsel %vm513_vm4, %v971_v27, 0.0 }
 0x337   : > { %601 = vadd.xlane.f32.xlu1 %v600_v28 }
 0x339   : > { %779 = vmatpush.bf16.msra.mxu0 %v763_v12 }
 0x33a   : > { %v710_v29 = vpop.xlane.xlu0 %709  ;;  %v548_v30 = vpop.permute.xlu2 %547 }
 0x33b   : > { %v711_v31 = vsub.f32 %v707_v15, %v710_v29  ;;  %v554_v32 = vsel %vm552_vm6, %v548_v30, 0 }
 0x33c   : > { %563 = vmatpush.bf16.msra.mxu2 %v554_v32 }
 0x33d   : > { %v712_v34 = vmul.f32 1.442695, %v711_v31 }
 0x33f   : > { %972 = vpow2.f32 %v712_v34 }
 0x340   : > { %974 = vpow2.f32 %v655_v35 }
 0x342   : > { %v721_v47 = vpop.permute.xlu2 %720 }
 0x343   : > { %v726_v49 = vsel %vm552_vm6, %v721_v47, 0 }
 0x345   : > { %v973_v36 = vpop.eup %972 }
 0x346   : > { %v714_v37 = vsel %vm513_vm4, %v973_v36, 0.0  ;;  %v975_v38 = vpop.eup %974 }
 0x347   : > { %715 = vadd.xlane.f32.xlu1 %v714_v37  ;;  %v657_v41 = vsel %vm513_vm4, %v975_v38, 0.0 }
 0x34d   : > { %v607_v39 = vpop.permute.xlu0 %606 }
 0x34e   : > { %v612_v40 = vsel %vm552_vm6, %v607_v39, 0 }
 0x34f   : > { %621 = vmatpush.bf16.msrb.mxu2 %v612_v40  ;;  %658 = vadd.xlane.f32.xlu1 %v657_v41 }
 0x355   : > { %v664_v42 = vpop.permute.xlu0 %663 }
 0x356   : > { %v669_v43 = vsel %vm552_vm6, %v664_v42, 0 }
 0x357   : > { %678 = vmatpush.bf16.msrb.mxu1 %v669_v43 }
 0x39c   : > { %v543_v44 = vpop.xlane.xlu1 %542 }
 0x39d   : > { %976 = vrcp.f32 %v543_v44 }
 0x3a3   : > { %v977_v45 = vpop.eup %976 }
 0x3a4   : > { %v545_v46 = vmul.f32 %v977_v45, %v969_v21 }
 0x3a6   : > { %v546_v48 = vpack.c.bf16 %v545_v46, %v545_v46 }
 0x3a8   : > { %906 = vmatmul.msk.bf16.vlgmr.msra.gmra.mxu2 %vm513_vm4, %v546_v48 }
 0x3a9   : > { %735 = vmatpush.bf16.msra.mxu2 %v726_v49 }
 0x3aa   : > { %v602_v50 = vpop.xlane.xlu1 %601 }
 0x3ab   : > { %978 = vrcp.f32 %v602_v50 }
 0x3b1   : > { %v979_v51 = vpop.eup %978 }
 0x3b2   : > { %v604_v52 = vmul.f32 %v979_v51, %v971_v27 }
 0x3b4   : > { %v605_v53 = vpack.c.bf16 %v604_v52, %v604_v52 }
 0x3b8   : > { %908 = vmatmul.msk.bf16.vlgmr.msrb.gmra.mxu2 %vm513_vm4, %v605_v53 }
 0x3ba   : > { %v716_v54 = vpop.xlane.xlu1 %715 }
 0x3bb   : > { %980 = vrcp.f32 %v716_v54 }
 0x3c1   : > { %v981_v55 = vpop.eup %980 }
 0x3c2   : > { %v718_v56 = vmul.f32 %v981_v55, %v973_v36  ;;  %v659_v57 = vpop.xlane.xlu1 %658 }
 0x3c3   : > { %982 = vrcp.f32 %v659_v57 }
 0x3c4   : > { %v719_v58 = vpack.c.bf16 %v718_v56, %v718_v56 }
 0x3c8   : > { %912 = vmatmul.msk.bf16.vlgmr.msra.gmra.mxu2 %vm513_vm4, %v719_v58 }
 0x3c9   : > { %v983_v59 = vpop.eup %982 }
 0x3ca   : > { %v661_v60 = vmul.f32 %v983_v59, %v975_v38 }
 0x3cc   : > { %v662_v61 = vpack.c.bf16 %v661_v60, %v661_v60 }
 0x3ce   : > { %910 = vmatmul.msk.bf16.vlgmr.msrb.gmra.mxu1 %vm513_vm4, %v662_v61 }
 0x42b   : > { %v565_v62 = vpop.f32.mrf.mxu2 }
 0x433   : > { %v567_v63 = vpop.f32.mrf.mxu2 }
 0x43b   : > { %v623_v1 = vpop.f32.mrf.mxu2 }
 0x43c   : > { %742 = vrot.lane.b32.xlu1 %v623_v1, %s1074_s24 }
 0x443   : > { %v625_v2 = vpop.f32.mrf.mxu2 }
 0x44b   : > { %v680_v3 = vpop.f32.mrf.mxu1  ;;  %v737_v4 = vpop.f32.mrf.mxu2 }
 0x44c   : > { %750 = vrot.lane.b32.xlu0 %v737_v4, %s1075_s25  ;;  %746 = vrot.lane.b32.xlu2 %v680_v3, %s1076_s27 }
 0x453   : > { %v682_v5 = vpop.f32.mrf.mxu1  ;;  %v739_v6 = vpop.f32.mrf.mxu2 }
 0x4a6   : > { %v747_v15 = vpop.permute.xlu2 %746 }
 0x4ae   : > { %v743_v13 = vpop.permute.xlu1 %742 }
 0x4af   : > { %v753_v14 = vsel %vm513_vm4, %v565_v62, %v743_v13 }
 0x4b0   : > { %v755_v17 = vsel %vm754_vm7, %v753_v14, %v747_v15 }
 0x4be   : > { %v751_v16 = vpop.permute.xlu0 %750 }
 0x4bf   : > { %v757_v18 = vsel %vm756_vm8, %v755_v17, %v751_v16 }
 0x4c0   : > { %v762_v19 = vpack.c.bf16 %v757_v18, %v757_v18 }
 0x4c2   : > { %913 = vmatmul.msk.bf16.vlgmr.msra.gmra.mxu0 %vm436_vm0, %v762_v19 }
 0x53f   : > { %v781_v21 = vpop.f32.mrf.mxu0 }
 0x540   : > { %v782_v22 = vadd.f32 %v961_v20, %v781_v21 }
 0x542   : > { %v785_v23 = vadd.f32 %v782_v22, %v1168_v0 }
 0x544   : > { %786 = vst.msk [vmem:[%s429_s21] sm:$0xff] %vm436_vm0, %v785_v23 }
 0x547   : > { %v783_v24 = vpop.f32.mrf.mxu0 }
 0x548 PF: > { %s22_s13 = sadd.s32 1, %s1058_s13  }
 0x549   : > { %p19_p7 = scmp.ge.s32.totalorder %s22_s13, 4  }
 0x54b   :  { %21 = sbr.rel (!%p19_p7) target bundleno = 2 (0x2), region = 108 }
 0x550   :  { %806 = vsyncpa [#allocation3], 1 }
 0x551   :  { %808 = vsyncpa [#allocation3 + $0x1], 1 }
 0x552   :  { %809 = vsyncpa [#allocation5], 1 }

</bundles_post_ra>
